<compile_context>
chip_gen: v6e
topology: v6e:2x2x1
jax: 0.10.0
libtpu: 0.0.40
codegen_flags: <defaults>
</compile_context>

<pallas_src>
import math

import jax
import jax.numpy as jnp
from jax.experimental import pallas as pl
from jax.experimental.pallas import tpu as pltpu

# ---------------- model config (small, synthetic) ----------------
VOCAB = 128
HIDDEN = 32
N_HEADS = 4
HEAD_D = HIDDEN // N_HEADS
FFN = 4 * HIDDEN
N_LAYER = 2
BATCH = 2
SEQ = 8
LN_EPS = 1e-5
M_TOKENS = BATCH * SEQ


# ---------------- fused Pallas kernel ----------------
def _mpt_fused_kernel(ids_ref, wte_ref, bias_ref,
                      ln1_g_ref, ln1_b_ref, wqkv_ref, bqkv_ref,
                      wo_ref, bo_ref, ln2_g_ref, ln2_b_ref,
                      wup_ref, bup_ref, wdn_ref, bdn_ref,
                      nfg_ref, nfb_ref, o_ref, heads_ref):
    M = M_TOKENS

    def layer_norm(x, g, b):
        mu = jnp.mean(x, axis=-1, keepdims=True)
        var = jnp.mean(jnp.square(x - mu), axis=-1, keepdims=True)
        return (x - mu) * jax.lax.rsqrt(var + LN_EPS) * g + b

    # --- wte embedding as an exact one-hot matmul (bf16 operands, f32 accumulation) ---
    ids = ids_ref[...]                                                    # [M, 1] int32
    vocab_iota = jax.lax.broadcasted_iota(jnp.int32, (M, VOCAB), 1)
    one_hot = (vocab_iota == ids).astype(jnp.bfloat16)                    # [M, VOCAB]
    h = jnp.dot(one_hot, wte_ref[...], preferred_element_type=jnp.float32)  # [M, H] f32

    for l in range(N_LAYER):
        x = h
        ln1 = layer_norm(x, ln1_g_ref[l], ln1_b_ref[l])

        # Fused QKV: single MXU matmul per layer. 1/sqrt(HEAD_D) already folded into
        # the Q block of wqkv/bqkv by the wrapper.
        qkv = jnp.dot(ln1.astype(jnp.bfloat16), wqkv_ref[l],
                      preferred_element_type=jnp.float32) + bqkv_ref[l]    # [M, 3H] f32
        qkv_bf = qkv.astype(jnp.bfloat16)                                  # one cast, sliced below

        # Per-head score / PV on static lane slices (heads are disjoint lane windows);
        # unnormalized softmax, scaling applied post-PV on the [M, D] result.
        for hh in range(N_HEADS):
            q_h = qkv_bf[:, hh * HEAD_D:(hh + 1) * HEAD_D]                 # [M, D]
            k_h = qkv_bf[:, HIDDEN + hh * HEAD_D: HIDDEN + (hh + 1) * HEAD_D]
            v_h = qkv_bf[:, 2 * HIDDEN + hh * HEAD_D: 2 * HIDDEN + (hh + 1) * HEAD_D]

            # contract last dims directly (no explicit k.T)
            s = jax.lax.dot_general(q_h, k_h, (((1,), (1,)), ((), ())),
                                    preferred_element_type=jnp.float32)    # [M, M]
            s = s + bias_ref[hh]                                           # precomputed mask+ALiBi
            mx = jnp.max(s, axis=-1, keepdims=True)
            p = jnp.exp(s - mx)
            rs = jnp.sum(p, axis=-1, keepdims=True)
            o_h = jnp.dot(p.astype(jnp.bfloat16), v_h,
                          preferred_element_type=jnp.float32)              # [M, D]
            heads_ref[:, hh * HEAD_D:(hh + 1) * HEAD_D] = (
                o_h * pl.reciprocal(rs, approx=True))

        # Merged-head out-projection: single [M,H]x[H,H] matmul; residual folded in.
        merged = heads_ref[...]
        attn = jnp.dot(merged.astype(jnp.bfloat16), wo_ref[l],
                       preferred_element_type=jnp.float32) + bo_ref[l]
        h1 = x + attn

        ln2 = layer_norm(h1, ln2_g_ref[l], ln2_b_ref[l])
        up = jnp.dot(ln2.astype(jnp.bfloat16), wup_ref[l],
                     preferred_element_type=jnp.float32) + bup_ref[l]
        # TODO(synk): torch nn.GELU() default is the exact erf form; tanh approximation used
        # for Mosaic lowering safety (differs at ~1e-3 relative level).
        up = jax.nn.gelu(up, approximate=True)
        down = jnp.dot(up.astype(jnp.bfloat16), wdn_ref[l],
                       preferred_element_type=jnp.float32) + bdn_ref[l]
        h = h1 + down                                                      # residual folded in

    # final LayerNorm; single [M, HIDDEN] HBM writeback for the whole model.
    o_ref[...] = layer_norm(h, nfg_ref[...], nfb_ref[...]).astype(o_ref.dtype)


# ---------------- parameter construction (deterministic, synthetic) ----------------
def gen_alibi_slopes(n_heads, alibi_bias_max=8):
    _n = 2 ** math.ceil(math.log2(n_heads))
    m = jnp.arange(1, _n + 1, dtype=jnp.float32) * (alibi_bias_max / _n)
    slopes = 1.0 / jnp.power(2.0, m)
    if _n != n_heads:
        slopes = jnp.concatenate([slopes[1::2], slopes[::2]])[:n_heads]
    return slopes


def init_params(key):
    keys = iter(jax.random.split(key, 64))
    scale = 0.02

    def w(shape):
        return scale * jax.random.normal(next(keys), shape, dtype=jnp.float32)

    params = {
        "wte": w((VOCAB, HIDDEN)),
        "normf_g": jnp.ones((HIDDEN,), jnp.float32),
        "normf_b": jnp.zeros((HIDDEN,), jnp.float32),
        "alibi_slopes": gen_alibi_slopes(N_HEADS),
        "layers": [],
    }
    for _ in range(N_LAYER):
        params["layers"].append({
            "ln1_g": jnp.ones((HIDDEN,), jnp.float32),
            "ln1_b": jnp.zeros((HIDDEN,), jnp.float32),
            "w_qkv": w((HIDDEN, 3 * HIDDEN)),
            "b_qkv": jnp.zeros((3 * HIDDEN,), jnp.float32),
            "w_o": w((HIDDEN, HIDDEN)),
            "b_o": jnp.zeros((HIDDEN,), jnp.float32),
            "ln2_g": jnp.ones((HIDDEN,), jnp.float32),
            "ln2_b": jnp.zeros((HIDDEN,), jnp.float32),
            "w_up": w((HIDDEN, FFN)),
            "b_up": jnp.zeros((FFN,), jnp.float32),
            "w_down": w((FFN, HIDDEN)),
            "b_down": jnp.zeros((HIDDEN,), jnp.float32),
        })
    return params


# ---------------- forward pass: weight/bias prep + ONE pallas_call ----------------
def mpt_forward(params, input_ids):
    B, S = input_ids.shape
    M = B * S
    L = N_LAYER
    layers = params["layers"]
    inv_sqrt_d = 1.0 / math.sqrt(HEAD_D)

    def stack(name):
        return jnp.stack([lyr[name] for lyr in layers])

    # Fold 1/sqrt(HEAD_D) into the Q block of the fused QKV weight/bias (pure weight prep),
    # and pre-cast all MXU weights to bf16 (f32 accumulation happens inside the kernel).
    qkv_scale = jnp.concatenate([
        jnp.full((HIDDEN,), inv_sqrt_d, jnp.float32),
        jnp.ones((2 * HIDDEN,), jnp.float32)])
    w_qkv = (stack("w_qkv") * qkv_scale[None, None, :]).astype(jnp.bfloat16)   # [L, H, 3H]
    b_qkv = (stack("b_qkv") * qkv_scale[None, :]).reshape(L, 1, 3 * HIDDEN)    # f32

    w_o = stack("w_o").astype(jnp.bfloat16)                  # [L, H, H]
    b_o = stack("b_o").reshape(L, 1, HIDDEN)
    ln1_g = stack("ln1_g").reshape(L, 1, HIDDEN)
    ln1_b = stack("ln1_b").reshape(L, 1, HIDDEN)
    ln2_g = stack("ln2_g").reshape(L, 1, HIDDEN)
    ln2_b = stack("ln2_b").reshape(L, 1, HIDDEN)
    w_up = stack("w_up").astype(jnp.bfloat16)                # [L, H, F]
    b_up = stack("b_up").reshape(L, 1, FFN)
    w_down = stack("w_down").astype(jnp.bfloat16)            # [L, F, H]
    b_down = stack("b_down").reshape(L, 1, HIDDEN)
    normf_g = params["normf_g"].reshape(1, HIDDEN)
    normf_b = params["normf_b"].reshape(1, HIDDEN)
    wte = params["wte"].astype(jnp.bfloat16)

    # Precompute the per-head masked causal(+batch-block-diagonal) ALiBi bias ONCE in plain
    # JAX; the kernel just adds it (shared by all layers). Prefill convention: start_pos=0,
    # bias = slope_h * (key_pos - (S-1)) on allowed entries, -1e30 elsewhere.
    row = jnp.arange(M)[:, None]
    col = jnp.arange(M)[None, :]
    allowed = jnp.logical_and(row // S == col // S, col <= row)            # [M, M]
    alibi_dist = (col % S).astype(jnp.float32) - (S - 1.0)                 # [1, M]
    slopes = params["alibi_slopes"]                                        # [nH]
    bias = jnp.where(allowed[None, :, :],
                     slopes[:, None, None] * alibi_dist[None, :, :],
                     -1e30).astype(jnp.float32)                            # [nH, M, M]

    ids2d = input_ids.reshape(M, 1).astype(jnp.int32)

    vmem = pl.BlockSpec(memory_space=pltpu.MemorySpace.VMEM)

    out = pl.pallas_call(
        _mpt_fused_kernel,
        out_shape=jax.ShapeDtypeStruct((M, HIDDEN), jnp.float32),
        in_specs=[vmem] * 17,
        out_specs=vmem,
        scratch_shapes=[pltpu.VMEM((M, HIDDEN), jnp.float32)],   # merged-head attn buffer
    )(ids2d, wte, bias,
      ln1_g, ln1_b, w_qkv, b_qkv, w_o, b_o,
      ln2_g, ln2_b, w_up, b_up, w_down, b_down, normf_g, normf_b)
    return out.reshape(B, S, HIDDEN)


if __name__ == "__main__":
    key = jax.random.PRNGKey(0)
    pkey, ikey = jax.random.split(key)
    params = init_params(pkey)
    input_ids = jax.random.randint(ikey, (BATCH, SEQ), 0, VOCAB, dtype=jnp.int32)
    out = jax.jit(mpt_forward)(params, input_ids)
    out = jax.block_until_ready(out)
    assert out.shape == (BATCH, SEQ, HIDDEN), out.shape
    assert bool(jnp.all(jnp.isfinite(out)))
    print("KERNEL_OK")
</pallas_src>

<mosaic_0001>
module attributes {stable_mosaic.version = 11 : i64} {
  func.func @_mpt_fused_kernel(%arg0: memref<16x1xi32, #tpu.memory_space<vmem>>, %arg1: memref<128x32xbf16, #tpu.memory_space<vmem>>, %arg2: memref<4x16x16xf32, #tpu.memory_space<vmem>>, %arg3: memref<2x1x32xf32, #tpu.memory_space<vmem>>, %arg4: memref<2x1x32xf32, #tpu.memory_space<vmem>>, %arg5: memref<2x32x96xbf16, #tpu.memory_space<vmem>>, %arg6: memref<2x1x96xf32, #tpu.memory_space<vmem>>, %arg7: memref<2x32x32xbf16, #tpu.memory_space<vmem>>, %arg8: memref<2x1x32xf32, #tpu.memory_space<vmem>>, %arg9: memref<2x1x32xf32, #tpu.memory_space<vmem>>, %arg10: memref<2x1x32xf32, #tpu.memory_space<vmem>>, %arg11: memref<2x32x128xbf16, #tpu.memory_space<vmem>>, %arg12: memref<2x1x128xf32, #tpu.memory_space<vmem>>, %arg13: memref<2x128x32xbf16, #tpu.memory_space<vmem>>, %arg14: memref<2x1x32xf32, #tpu.memory_space<vmem>>, %arg15: memref<1x32xf32, #tpu.memory_space<vmem>>, %arg16: memref<1x32xf32, #tpu.memory_space<vmem>>, %arg17: memref<16x32xf32, #tpu.memory_space<vmem>>, %arg18: memref<16x32xf32, #tpu.memory_space<vmem>>) attributes {dimension_semantics = [], scalar_prefetch = 0 : i64, scratch_operands = 1 : i64, tpu.core_type = #tpu.core_type<tc>} {
    %c0 = arith.constant 0 : index
    %c0_0 = arith.constant 0 : index
    %0 = vector.load %arg0[%c0, %c0_0] : memref<16x1xi32, #tpu.memory_space<vmem>>, vector<16x1xi32>
    %1 = tpu.iota {dimensions = array<i32: 1>} : vector<16x128xi32>
    %2 = vector.broadcast %0 : vector<16x1xi32> to vector<16x128xi32>
    %3 = arith.cmpi eq, %1, %2 : vector<16x128xi32>
    %4 = arith.extui %3 : vector<16x128xi1> to vector<16x128xi32>
    %5 = arith.sitofp %4 : vector<16x128xi32> to vector<16x128xf32>
    %6 = arith.truncf %5 : vector<16x128xf32> to vector<16x128xbf16>
    %c0_1 = arith.constant 0 : index
    %c0_2 = arith.constant 0 : index
    %7 = vector.load %arg1[%c0_1, %c0_2] : memref<128x32xbf16, #tpu.memory_space<vmem>>, vector<128x32xbf16>
    %cst = arith.constant dense<0.000000e+00> : vector<16x32xf32>
    %8 = tpu.matmul %6, %7, %cst {dimension_numbers = #tpu.dot_dimension_numbers<[1], [0], [0], [1], [0, 0, 1, 1], [], []>} : vector<16x128xbf16>, vector<128x32xbf16>, vector<16x32xf32> -> vector<16x32xf32>
    %c0_3 = arith.constant 0 : index
    %c0_4 = arith.constant 0 : index
    %c0_5 = arith.constant 0 : index
    %9 = vector.load %arg3[%c0_3, %c0_4, %c0_5] : memref<2x1x32xf32, #tpu.memory_space<vmem>>, vector<1x1x32xf32>
    %10 = vector.shape_cast %9 : vector<1x1x32xf32> to vector<1x32xf32>
    %c0_6 = arith.constant 0 : index
    %c0_7 = arith.constant 0 : index
    %c0_8 = arith.constant 0 : index
    %11 = vector.load %arg4[%c0_6, %c0_7, %c0_8] : memref<2x1x32xf32, #tpu.memory_space<vmem>>, vector<1x1x32xf32>
    %12 = vector.shape_cast %11 : vector<1x1x32xf32> to vector<1x32xf32>
    %cst_9 = arith.constant dense<0.000000e+00> : vector<16xf32>
    %13 = vector.multi_reduction <add>, %8, %cst_9 [1] : vector<16x32xf32> to vector<16xf32>
    %14 = vector.shape_cast %13 : vector<16xf32> to vector<16x1xf32>
    %cst_10 = arith.constant 3.200000e+01 : f32
    %15 = vector.broadcast %cst_10 : f32 to vector<16x1xf32>
    %16 = arith.divf %14, %15 : vector<16x1xf32>
    %17 = vector.broadcast %16 : vector<16x1xf32> to vector<16x32xf32>
    %18 = arith.subf %8, %17 : vector<16x32xf32>
    %19 = arith.mulf %18, %18 : vector<16x32xf32>
    %cst_11 = arith.constant dense<0.000000e+00> : vector<16xf32>
    %20 = vector.multi_reduction <add>, %19, %cst_11 [1] : vector<16x32xf32> to vector<16xf32>
    %21 = vector.shape_cast %20 : vector<16xf32> to vector<16x1xf32>
    %cst_12 = arith.constant 3.200000e+01 : f32
    %22 = vector.broadcast %cst_12 : f32 to vector<16x1xf32>
    %23 = arith.divf %21, %22 : vector<16x1xf32>
    %24 = vector.broadcast %16 : vector<16x1xf32> to vector<16x32xf32>
    %25 = arith.subf %8, %24 : vector<16x32xf32>
    %cst_13 = arith.constant 9.99999974E-6 : f32
    %26 = vector.broadcast %cst_13 : f32 to vector<16x1xf32>
    %27 = arith.addf %23, %26 : vector<16x1xf32>
    %28 = math.rsqrt %27 : vector<16x1xf32>
    %29 = vector.broadcast %28 : vector<16x1xf32> to vector<16x32xf32>
    %30 = arith.mulf %25, %29 : vector<16x32xf32>
    %31 = vector.broadcast %10 : vector<1x32xf32> to vector<16x32xf32>
    %32 = arith.mulf %30, %31 : vector<16x32xf32>
    %33 = vector.broadcast %12 : vector<1x32xf32> to vector<16x32xf32>
    %34 = arith.addf %32, %33 : vector<16x32xf32>
    %35 = arith.truncf %34 : vector<16x32xf32> to vector<16x32xbf16>
    %c0_14 = arith.constant 0 : index
    %c0_15 = arith.constant 0 : index
    %c0_16 = arith.constant 0 : index
    %36 = vector.load %arg5[%c0_14, %c0_15, %c0_16] : memref<2x32x96xbf16, #tpu.memory_space<vmem>>, vector<1x32x96xbf16>
    %37 = vector.shape_cast %36 : vector<1x32x96xbf16> to vector<32x96xbf16>
    %cst_17 = arith.constant dense<0.000000e+00> : vector<16x96xf32>
    %38 = tpu.matmul %35, %37, %cst_17 {dimension_numbers = #tpu.dot_dimension_numbers<[1], [0], [0], [1], [0, 0, 1, 1], [], []>} : vector<16x32xbf16>, vector<32x96xbf16>, vector<16x96xf32> -> vector<16x96xf32>
    %c0_18 = arith.constant 0 : index
    %c0_19 = arith.constant 0 : index
    %c0_20 = arith.constant 0 : index
    %39 = vector.load %arg6[%c0_18, %c0_19, %c0_20] : memref<2x1x96xf32, #tpu.memory_space<vmem>>, vector<1x1x96xf32>
    %40 = vector.shape_cast %39 : vector<1x1x96xf32> to vector<1x96xf32>
    %41 = vector.broadcast %40 : vector<1x96xf32> to vector<16x96xf32>
    %42 = arith.addf %38, %41 : vector<16x96xf32>
    %43 = arith.truncf %42 : vector<16x96xf32> to vector<16x96xbf16>
    %44 = vector.extract_strided_slice %43 {offsets = [0, 0], sizes = [16, 8], strides = [1, 1]} : vector<16x96xbf16> to vector<16x8xbf16>
    %45 = vector.extract_strided_slice %43 {offsets = [0, 32], sizes = [16, 8], strides = [1, 1]} : vector<16x96xbf16> to vector<16x8xbf16>
    %46 = vector.extract_strided_slice %43 {offsets = [0, 64], sizes = [16, 8], strides = [1, 1]} : vector<16x96xbf16> to vector<16x8xbf16>
    %cst_21 = arith.constant dense<0.000000e+00> : vector<16x16xf32>
    %47 = tpu.matmul %44, %45, %cst_21 {dimension_numbers = #tpu.dot_dimension_numbers<[1], [1], [0], [0], [0, 0, 1, 0], [], []>} : vector<16x8xbf16>, vector<16x8xbf16>, vector<16x16xf32> -> vector<16x16xf32>
    %c0_22 = arith.constant 0 : index
    %c0_23 = arith.constant 0 : index
    %c0_24 = arith.constant 0 : index
    %48 = vector.load %arg2[%c0_22, %c0_23, %c0_24] : memref<4x16x16xf32, #tpu.memory_space<vmem>>, vector<1x16x16xf32>
    %49 = vector.shape_cast %48 : vector<1x16x16xf32> to vector<16x16xf32>
    %50 = arith.addf %47, %49 : vector<16x16xf32>
    %cst_25 = arith.constant dense<0xFF800000> : vector<16xf32>
    %51 = vector.multi_reduction <maximumf>, %50, %cst_25 [1] : vector<16x16xf32> to vector<16xf32>
    %52 = vector.shape_cast %51 : vector<16xf32> to vector<16x1xf32>
    %53 = vector.broadcast %52 : vector<16x1xf32> to vector<16x16xf32>
    %54 = arith.subf %50, %53 : vector<16x16xf32>
    %55 = math.exp %54 : vector<16x16xf32>
    %cst_26 = arith.constant dense<0.000000e+00> : vector<16xf32>
    %56 = vector.multi_reduction <add>, %55, %cst_26 [1] : vector<16x16xf32> to vector<16xf32>
    %57 = vector.shape_cast %56 : vector<16xf32> to vector<16x1xf32>
    %58 = arith.truncf %55 : vector<16x16xf32> to vector<16x16xbf16>
    %cst_27 = arith.constant dense<0.000000e+00> : vector<16x8xf32>
    %59 = tpu.matmul %58, %46, %cst_27 {dimension_numbers = #tpu.dot_dimension_numbers<[1], [0], [0], [1], [0, 0, 1, 1], [], []>} : vector<16x16xbf16>, vector<16x8xbf16>, vector<16x8xf32> -> vector<16x8xf32>
    %60 = tpu.reciprocal %57 {approx = true} : vector<16x1xf32> -> vector<16x1xf32>
    %61 = vector.broadcast %60 : vector<16x1xf32> to vector<16x8xf32>
    %62 = arith.mulf %59, %61 : vector<16x8xf32>
    %c0_28 = arith.constant 0 : index
    %c0_29 = arith.constant 0 : index
    %63 = vector.load %arg18[%c0_28, %c0_29] : memref<16x32xf32, #tpu.memory_space<vmem>>, vector<16x8xf32>
    tpu.vector_store %arg18[%c0_28, %c0_29], %62 {strides = array<i32>} : memref<16x32xf32, #tpu.memory_space<vmem>>, vector<16x8xf32>,
    %64 = vector.extract_strided_slice %43 {offsets = [0, 8], sizes = [16, 8], strides = [1, 1]} : vector<16x96xbf16> to vector<16x8xbf16>
    %65 = vector.extract_strided_slice %43 {offsets = [0, 40], sizes = [16, 8], strides = [1, 1]} : vector<16x96xbf16> to vector<16x8xbf16>
    %66 = vector.extract_strided_slice %43 {offsets = [0, 72], sizes = [16, 8], strides = [1, 1]} : vector<16x96xbf16> to vector<16x8xbf16>
    %cst_30 = arith.constant dense<0.000000e+00> : vector<16x16xf32>
    %67 = tpu.matmul %64, %65, %cst_30 {dimension_numbers = #tpu.dot_dimension_numbers<[1], [1], [0], [0], [0, 0, 1, 0], [], []>} : vector<16x8xbf16>, vector<16x8xbf16>, vector<16x16xf32> -> vector<16x16xf32>
    %c1 = arith.constant 1 : index
    %c0_31 = arith.constant 0 : index
    %c0_32 = arith.constant 0 : index
    %68 = vector.load %arg2[%c1, %c0_31, %c0_32] : memref<4x16x16xf32, #tpu.memory_space<vmem>>, vector<1x16x16xf32>
    %69 = vector.shape_cast %68 : vector<1x16x16xf32> to vector<16x16xf32>
    %70 = arith.addf %67, %69 : vector<16x16xf32>
    %cst_33 = arith.constant dense<0xFF800000> : vector<16xf32>
    %71 = vector.multi_reduction <maximumf>, %70, %cst_33 [1] : vector<16x16xf32> to vector<16xf32>
    %72 = vector.shape_cast %71 : vector<16xf32> to vector<16x1xf32>
    %73 = vector.broadcast %72 : vector<16x1xf32> to vector<16x16xf32>
    %74 = arith.subf %70, %73 : vector<16x16xf32>
    %75 = math.exp %74 : vector<16x16xf32>
    %cst_34 = arith.constant dense<0.000000e+00> : vector<16xf32>
    %76 = vector.multi_reduction <add>, %75, %cst_34 [1] : vector<16x16xf32> to vector<16xf32>
    %77 = vector.shape_cast %76 : vector<16xf32> to vector<16x1xf32>
    %78 = arith.truncf %75 : vector<16x16xf32> to vector<16x16xbf16>
    %cst_35 = arith.constant dense<0.000000e+00> : vector<16x8xf32>
    %79 = tpu.matmul %78, %66, %cst_35 {dimension_numbers = #tpu.dot_dimension_numbers<[1], [0], [0], [1], [0, 0, 1, 1], [], []>} : vector<16x16xbf16>, vector<16x8xbf16>, vector<16x8xf32> -> vector<16x8xf32>
    %80 = tpu.reciprocal %77 {approx = true} : vector<16x1xf32> -> vector<16x1xf32>
    %81 = vector.broadcast %80 : vector<16x1xf32> to vector<16x8xf32>
    %82 = arith.mulf %79, %81 : vector<16x8xf32>
    %c0_36 = arith.constant 0 : index
    %c8 = arith.constant 8 : index
    %83 = vector.load %arg18[%c0_36, %c8] : memref<16x32xf32, #tpu.memory_space<vmem>>, vector<16x8xf32>
    tpu.vector_store %arg18[%c0_36, %c8], %82 {strides = array<i32>} : memref<16x32xf32, #tpu.memory_space<vmem>>, vector<16x8xf32>,
    %84 = vector.extract_strided_slice %43 {offsets = [0, 16], sizes = [16, 8], strides = [1, 1]} : vector<16x96xbf16> to vector<16x8xbf16>
    %85 = vector.extract_strided_slice %43 {offsets = [0, 48], sizes = [16, 8], strides = [1, 1]} : vector<16x96xbf16> to vector<16x8xbf16>
    %86 = vector.extract_strided_slice %43 {offsets = [0, 80], sizes = [16, 8], strides = [1, 1]} : vector<16x96xbf16> to vector<16x8xbf16>
    %cst_37 = arith.constant dense<0.000000e+00> : vector<16x16xf32>
    %87 = tpu.matmul %84, %85, %cst_37 {dimension_numbers = #tpu.dot_dimension_numbers<[1], [1], [0], [0], [0, 0, 1, 0], [], []>} : vector<16x8xbf16>, vector<16x8xbf16>, vector<16x16xf32> -> vector<16x16xf32>
    %c2 = arith.constant 2 : index
    %c0_38 = arith.constant 0 : index
    %c0_39 = arith.constant 0 : index
    %88 = vector.load %arg2[%c2, %c0_38, %c0_39] : memref<4x16x16xf32, #tpu.memory_space<vmem>>, vector<1x16x16xf32>
    %89 = vector.shape_cast %88 : vector<1x16x16xf32> to vector<16x16xf32>
    %90 = arith.addf %87, %89 : vector<16x16xf32>
    %cst_40 = arith.constant dense<0xFF800000> : vector<16xf32>
    %91 = vector.multi_reduction <maximumf>, %90, %cst_40 [1] : vector<16x16xf32> to vector<16xf32>
    %92 = vector.shape_cast %91 : vector<16xf32> to vector<16x1xf32>
    %93 = vector.broadcast %92 : vector<16x1xf32> to vector<16x16xf32>
    %94 = arith.subf %90, %93 : vector<16x16xf32>
    %95 = math.exp %94 : vector<16x16xf32>
    %cst_41 = arith.constant dense<0.000000e+00> : vector<16xf32>
    %96 = vector.multi_reduction <add>, %95, %cst_41 [1] : vector<16x16xf32> to vector<16xf32>
    %97 = vector.shape_cast %96 : vector<16xf32> to vector<16x1xf32>
    %98 = arith.truncf %95 : vector<16x16xf32> to vector<16x16xbf16>
    %cst_42 = arith.constant dense<0.000000e+00> : vector<16x8xf32>
    %99 = tpu.matmul %98, %86, %cst_42 {dimension_numbers = #tpu.dot_dimension_numbers<[1], [0], [0], [1], [0, 0, 1, 1], [], []>} : vector<16x16xbf16>, vector<16x8xbf16>, vector<16x8xf32> -> vector<16x8xf32>
    %100 = tpu.reciprocal %97 {approx = true} : vector<16x1xf32> -> vector<16x1xf32>
    %101 = vector.broadcast %100 : vector<16x1xf32> to vector<16x8xf32>
    %102 = arith.mulf %99, %101 : vector<16x8xf32>
    %c0_43 = arith.constant 0 : index
    %c16 = arith.constant 16 : index
    %103 = vector.load %arg18[%c0_43, %c16] : memref<16x32xf32, #tpu.memory_space<vmem>>, vector<16x8xf32>
    tpu.vector_store %arg18[%c0_43, %c16], %102 {strides = array<i32>} : memref<16x32xf32, #tpu.memory_space<vmem>>, vector<16x8xf32>,
    %104 = vector.extract_strided_slice %43 {offsets = [0, 24], sizes = [16, 8], strides = [1, 1]} : vector<16x96xbf16> to vector<16x8xbf16>
    %105 = vector.extract_strided_slice %43 {offsets = [0, 56], sizes = [16, 8], strides = [1, 1]} : vector<16x96xbf16> to vector<16x8xbf16>
    %106 = vector.extract_strided_slice %43 {offsets = [0, 88], sizes = [16, 8], strides = [1, 1]} : vector<16x96xbf16> to vector<16x8xbf16>
    %cst_44 = arith.constant dense<0.000000e+00> : vector<16x16xf32>
    %107 = tpu.matmul %104, %105, %cst_44 {dimension_numbers = #tpu.dot_dimension_numbers<[1], [1], [0], [0], [0, 0, 1, 0], [], []>} : vector<16x8xbf16>, vector<16x8xbf16>, vector<16x16xf32> -> vector<16x16xf32>
    %c3 = arith.constant 3 : index
    %c0_45 = arith.constant 0 : index
    %c0_46 = arith.constant 0 : index
    %108 = vector.load %arg2[%c3, %c0_45, %c0_46] : memref<4x16x16xf32, #tpu.memory_space<vmem>>, vector<1x16x16xf32>
    %109 = vector.shape_cast %108 : vector<1x16x16xf32> to vector<16x16xf32>
    %110 = arith.addf %107, %109 : vector<16x16xf32>
    %cst_47 = arith.constant dense<0xFF800000> : vector<16xf32>
    %111 = vector.multi_reduction <maximumf>, %110, %cst_47 [1] : vector<16x16xf32> to vector<16xf32>
    %112 = vector.shape_cast %111 : vector<16xf32> to vector<16x1xf32>
    %113 = vector.broadcast %112 : vector<16x1xf32> to vector<16x16xf32>
    %114 = arith.subf %110, %113 : vector<16x16xf32>
    %115 = math.exp %114 : vector<16x16xf32>
    %cst_48 = arith.constant dense<0.000000e+00> : vector<16xf32>
    %116 = vector.multi_reduction <add>, %115, %cst_48 [1] : vector<16x16xf32> to vector<16xf32>
    %117 = vector.shape_cast %116 : vector<16xf32> to vector<16x1xf32>
    %118 = arith.truncf %115 : vector<16x16xf32> to vector<16x16xbf16>
    %cst_49 = arith.constant dense<0.000000e+00> : vector<16x8xf32>
    %119 = tpu.matmul %118, %106, %cst_49 {dimension_numbers = #tpu.dot_dimension_numbers<[1], [0], [0], [1], [0, 0, 1, 1], [], []>} : vector<16x16xbf16>, vector<16x8xbf16>, vector<16x8xf32> -> vector<16x8xf32>
    %120 = tpu.reciprocal %117 {approx = true} : vector<16x1xf32> -> vector<16x1xf32>
    %121 = vector.broadcast %120 : vector<16x1xf32> to vector<16x8xf32>
    %122 = arith.mulf %119, %121 : vector<16x8xf32>
    %c0_50 = arith.constant 0 : index
    %c24 = arith.constant 24 : index
    %123 = vector.load %arg18[%c0_50, %c24] : memref<16x32xf32, #tpu.memory_space<vmem>>, vector<16x8xf32>
    tpu.vector_store %arg18[%c0_50, %c24], %122 {strides = array<i32>} : memref<16x32xf32, #tpu.memory_space<vmem>>, vector<16x8xf32>,
    %c0_51 = arith.constant 0 : index
    %c0_52 = arith.constant 0 : index
    %124 = vector.load %arg18[%c0_51, %c0_52] : memref<16x32xf32, #tpu.memory_space<vmem>>, vector<16x32xf32>
    %125 = arith.truncf %124 : vector<16x32xf32> to vector<16x32xbf16>
    %c0_53 = arith.constant 0 : index
    %c0_54 = arith.constant 0 : index
    %c0_55 = arith.constant 0 : index
    %126 = vector.load %arg7[%c0_53, %c0_54, %c0_55] : memref<2x32x32xbf16, #tpu.memory_space<vmem>>, vector<1x32x32xbf16>
    %127 = vector.shape_cast %126 : vector<1x32x32xbf16> to vector<32x32xbf16>
    %cst_56 = arith.constant dense<0.000000e+00> : vector<16x32xf32>
    %128 = tpu.matmul %125, %127, %cst_56 {dimension_numbers = #tpu.dot_dimension_numbers<[1], [0], [0], [1], [0, 0, 1, 1], [], []>} : vector<16x32xbf16>, vector<32x32xbf16>, vector<16x32xf32> -> vector<16x32xf32>
    %c0_57 = arith.constant 0 : index
    %c0_58 = arith.constant 0 : index
    %c0_59 = arith.constant 0 : index
    %129 = vector.load %arg8[%c0_57, %c0_58, %c0_59] : memref<2x1x32xf32, #tpu.memory_space<vmem>>, vector<1x1x32xf32>
    %130 = vector.shape_cast %129 : vector<1x1x32xf32> to vector<1x32xf32>
    %131 = vector.broadcast %130 : vector<1x32xf32> to vector<16x32xf32>
    %132 = arith.addf %128, %131 : vector<16x32xf32>
    %133 = arith.addf %8, %132 : vector<16x32xf32>
    %c0_60 = arith.constant 0 : index
    %c0_61 = arith.constant 0 : index
    %c0_62 = arith.constant 0 : index
    %134 = vector.load %arg9[%c0_60, %c0_61, %c0_62] : memref<2x1x32xf32, #tpu.memory_space<vmem>>, vector<1x1x32xf32>
    %135 = vector.shape_cast %134 : vector<1x1x32xf32> to vector<1x32xf32>
    %c0_63 = arith.constant 0 : index
    %c0_64 = arith.constant 0 : index
    %c0_65 = arith.constant 0 : index
    %136 = vector.load %arg10[%c0_63, %c0_64, %c0_65] : memref<2x1x32xf32, #tpu.memory_space<vmem>>, vector<1x1x32xf32>
    %137 = vector.shape_cast %136 : vector<1x1x32xf32> to vector<1x32xf32>
    %cst_66 = arith.constant dense<0.000000e+00> : vector<16xf32>
    %138 = vector.multi_reduction <add>, %133, %cst_66 [1] : vector<16x32xf32> to vector<16xf32>
    %139 = vector.shape_cast %138 : vector<16xf32> to vector<16x1xf32>
    %cst_67 = arith.constant 3.200000e+01 : f32
    %140 = vector.broadcast %cst_67 : f32 to vector<16x1xf32>
    %141 = arith.divf %139, %140 : vector<16x1xf32>
    %142 = vector.broadcast %141 : vector<16x1xf32> to vector<16x32xf32>
    %143 = arith.subf %133, %142 : vector<16x32xf32>
    %144 = arith.mulf %143, %143 : vector<16x32xf32>
    %cst_68 = arith.constant dense<0.000000e+00> : vector<16xf32>
    %145 = vector.multi_reduction <add>, %144, %cst_68 [1] : vector<16x32xf32> to vector<16xf32>
    %146 = vector.shape_cast %145 : vector<16xf32> to vector<16x1xf32>
    %cst_69 = arith.constant 3.200000e+01 : f32
    %147 = vector.broadcast %cst_69 : f32 to vector<16x1xf32>
    %148 = arith.divf %146, %147 : vector<16x1xf32>
    %149 = vector.broadcast %141 : vector<16x1xf32> to vector<16x32xf32>
    %150 = arith.subf %133, %149 : vector<16x32xf32>
    %cst_70 = arith.constant 9.99999974E-6 : f32
    %151 = vector.broadcast %cst_70 : f32 to vector<16x1xf32>
    %152 = arith.addf %148, %151 : vector<16x1xf32>
    %153 = math.rsqrt %152 : vector<16x1xf32>
    %154 = vector.broadcast %153 : vector<16x1xf32> to vector<16x32xf32>
    %155 = arith.mulf %150, %154 : vector<16x32xf32>
    %156 = vector.broadcast %135 : vector<1x32xf32> to vector<16x32xf32>
    %157 = arith.mulf %155, %156 : vector<16x32xf32>
    %158 = vector.broadcast %137 : vector<1x32xf32> to vector<16x32xf32>
    %159 = arith.addf %157, %158 : vector<16x32xf32>
    %160 = arith.truncf %159 : vector<16x32xf32> to vector<16x32xbf16>
    %c0_71 = arith.constant 0 : index
    %c0_72 = arith.constant 0 : index
    %c0_73 = arith.constant 0 : index
    %161 = vector.load %arg11[%c0_71, %c0_72, %c0_73] : memref<2x32x128xbf16, #tpu.memory_space<vmem>>, vector<1x32x128xbf16>
    %162 = vector.shape_cast %161 : vector<1x32x128xbf16> to vector<32x128xbf16>
    %cst_74 = arith.constant dense<0.000000e+00> : vector<16x128xf32>
    %163 = tpu.matmul %160, %162, %cst_74 {dimension_numbers = #tpu.dot_dimension_numbers<[1], [0], [0], [1], [0, 0, 1, 1], [], []>} : vector<16x32xbf16>, vector<32x128xbf16>, vector<16x128xf32> -> vector<16x128xf32>
    %c0_75 = arith.constant 0 : index
    %c0_76 = arith.constant 0 : index
    %c0_77 = arith.constant 0 : index
    %164 = vector.load %arg12[%c0_75, %c0_76, %c0_77] : memref<2x1x128xf32, #tpu.memory_space<vmem>>, vector<1x1x128xf32>
    %165 = vector.shape_cast %164 : vector<1x1x128xf32> to vector<1x128xf32>
    %166 = vector.broadcast %165 : vector<1x128xf32> to vector<16x128xf32>
    %167 = arith.addf %163, %166 : vector<16x128xf32>
    %168 = arith.mulf %167, %167 : vector<16x128xf32>
    %169 = arith.mulf %167, %168 : vector<16x128xf32>
    %cst_78 = arith.constant 4.471500e-02 : f32
    %170 = vector.broadcast %cst_78 : f32 to vector<16x128xf32>
    %171 = arith.mulf %170, %169 : vector<16x128xf32>
    %172 = arith.addf %167, %171 : vector<16x128xf32>
    %cst_79 = arith.constant 0.797884583 : f32
    %173 = vector.broadcast %cst_79 : f32 to vector<16x128xf32>
    %174 = arith.mulf %173, %172 : vector<16x128xf32>
    %175 = math.tanh %174 : vector<16x128xf32>
    %cst_80 = arith.constant 1.000000e+00 : f32
    %176 = vector.broadcast %cst_80 : f32 to vector<16x128xf32>
    %177 = arith.addf %176, %175 : vector<16x128xf32>
    %cst_81 = arith.constant 5.000000e-01 : f32
    %178 = vector.broadcast %cst_81 : f32 to vector<16x128xf32>
    %179 = arith.mulf %178, %177 : vector<16x128xf32>
    %180 = arith.mulf %167, %179 : vector<16x128xf32>
    %181 = arith.truncf %180 : vector<16x128xf32> to vector<16x128xbf16>
    %c0_82 = arith.constant 0 : index
    %c0_83 = arith.constant 0 : index
    %c0_84 = arith.constant 0 : index
    %182 = vector.load %arg13[%c0_82, %c0_83, %c0_84] : memref<2x128x32xbf16, #tpu.memory_space<vmem>>, vector<1x128x32xbf16>
    %183 = vector.shape_cast %182 : vector<1x128x32xbf16> to vector<128x32xbf16>
    %cst_85 = arith.constant dense<0.000000e+00> : vector<16x32xf32>
    %184 = tpu.matmul %181, %183, %cst_85 {dimension_numbers = #tpu.dot_dimension_numbers<[1], [0], [0], [1], [0, 0, 1, 1], [], []>} : vector<16x128xbf16>, vector<128x32xbf16>, vector<16x32xf32> -> vector<16x32xf32>
    %c0_86 = arith.constant 0 : index
    %c0_87 = arith.constant 0 : index
    %c0_88 = arith.constant 0 : index
    %185 = vector.load %arg14[%c0_86, %c0_87, %c0_88] : memref<2x1x32xf32, #tpu.memory_space<vmem>>, vector<1x1x32xf32>
    %186 = vector.shape_cast %185 : vector<1x1x32xf32> to vector<1x32xf32>
    %187 = vector.broadcast %186 : vector<1x32xf32> to vector<16x32xf32>
    %188 = arith.addf %184, %187 : vector<16x32xf32>
    %189 = arith.addf %133, %188 : vector<16x32xf32>
    %c1_89 = arith.constant 1 : index
    %c0_90 = arith.constant 0 : index
    %c0_91 = arith.constant 0 : index
    %190 = vector.load %arg3[%c1_89, %c0_90, %c0_91] : memref<2x1x32xf32, #tpu.memory_space<vmem>>, vector<1x1x32xf32>
    %191 = vector.shape_cast %190 : vector<1x1x32xf32> to vector<1x32xf32>
    %c1_92 = arith.constant 1 : index
    %c0_93 = arith.constant 0 : index
    %c0_94 = arith.constant 0 : index
    %192 = vector.load %arg4[%c1_92, %c0_93, %c0_94] : memref<2x1x32xf32, #tpu.memory_space<vmem>>, vector<1x1x32xf32>
    %193 = vector.shape_cast %192 : vector<1x1x32xf32> to vector<1x32xf32>
    %cst_95 = arith.constant dense<0.000000e+00> : vector<16xf32>
    %194 = vector.multi_reduction <add>, %189, %cst_95 [1] : vector<16x32xf32> to vector<16xf32>
    %195 = vector.shape_cast %194 : vector<16xf32> to vector<16x1xf32>
    %cst_96 = arith.constant 3.200000e+01 : f32
    %196 = vector.broadcast %cst_96 : f32 to vector<16x1xf32>
    %197 = arith.divf %195, %196 : vector<16x1xf32>
    %198 = vector.broadcast %197 : vector<16x1xf32> to vector<16x32xf32>
    %199 = arith.subf %189, %198 : vector<16x32xf32>
    %200 = arith.mulf %199, %199 : vector<16x32xf32>
    %cst_97 = arith.constant dense<0.000000e+00> : vector<16xf32>
    %201 = vector.multi_reduction <add>, %200, %cst_97 [1] : vector<16x32xf32> to vector<16xf32>
    %202 = vector.shape_cast %201 : vector<16xf32> to vector<16x1xf32>
    %cst_98 = arith.constant 3.200000e+01 : f32
    %203 = vector.broadcast %cst_98 : f32 to vector<16x1xf32>
    %204 = arith.divf %202, %203 : vector<16x1xf32>
    %205 = vector.broadcast %197 : vector<16x1xf32> to vector<16x32xf32>
    %206 = arith.subf %189, %205 : vector<16x32xf32>
    %cst_99 = arith.constant 9.99999974E-6 : f32
    %207 = vector.broadcast %cst_99 : f32 to vector<16x1xf32>
    %208 = arith.addf %204, %207 : vector<16x1xf32>
    %209 = math.rsqrt %208 : vector<16x1xf32>
    %210 = vector.broadcast %209 : vector<16x1xf32> to vector<16x32xf32>
    %211 = arith.mulf %206, %210 : vector<16x32xf32>
    %212 = vector.broadcast %191 : vector<1x32xf32> to vector<16x32xf32>
    %213 = arith.mulf %211, %212 : vector<16x32xf32>
    %214 = vector.broadcast %193 : vector<1x32xf32> to vector<16x32xf32>
    %215 = arith.addf %213, %214 : vector<16x32xf32>
    %216 = arith.truncf %215 : vector<16x32xf32> to vector<16x32xbf16>
    %c1_100 = arith.constant 1 : index
    %c0_101 = arith.constant 0 : index
    %c0_102 = arith.constant 0 : index
    %217 = vector.load %arg5[%c1_100, %c0_101, %c0_102] : memref<2x32x96xbf16, #tpu.memory_space<vmem>>, vector<1x32x96xbf16>
    %218 = vector.shape_cast %217 : vector<1x32x96xbf16> to vector<32x96xbf16>
    %cst_103 = arith.constant dense<0.000000e+00> : vector<16x96xf32>
    %219 = tpu.matmul %216, %218, %cst_103 {dimension_numbers = #tpu.dot_dimension_numbers<[1], [0], [0], [1], [0, 0, 1, 1], [], []>} : vector<16x32xbf16>, vector<32x96xbf16>, vector<16x96xf32> -> vector<16x96xf32>
    %c1_104 = arith.constant 1 : index
    %c0_105 = arith.constant 0 : index
    %c0_106 = arith.constant 0 : index
    %220 = vector.load %arg6[%c1_104, %c0_105, %c0_106] : memref<2x1x96xf32, #tpu.memory_space<vmem>>, vector<1x1x96xf32>
    %221 = vector.shape_cast %220 : vector<1x1x96xf32> to vector<1x96xf32>
    %222 = vector.broadcast %221 : vector<1x96xf32> to vector<16x96xf32>
    %223 = arith.addf %219, %222 : vector<16x96xf32>
    %224 = arith.truncf %223 : vector<16x96xf32> to vector<16x96xbf16>
    %225 = vector.extract_strided_slice %224 {offsets = [0, 0], sizes = [16, 8], strides = [1, 1]} : vector<16x96xbf16> to vector<16x8xbf16>
    %226 = vector.extract_strided_slice %224 {offsets = [0, 32], sizes = [16, 8], strides = [1, 1]} : vector<16x96xbf16> to vector<16x8xbf16>
    %227 = vector.extract_strided_slice %224 {offsets = [0, 64], sizes = [16, 8], strides = [1, 1]} : vector<16x96xbf16> to vector<16x8xbf16>
    %cst_107 = arith.constant dense<0.000000e+00> : vector<16x16xf32>
    %228 = tpu.matmul %225, %226, %cst_107 {dimension_numbers = #tpu.dot_dimension_numbers<[1], [1], [0], [0], [0, 0, 1, 0], [], []>} : vector<16x8xbf16>, vector<16x8xbf16>, vector<16x16xf32> -> vector<16x16xf32>
    %c0_108 = arith.constant 0 : index
    %c0_109 = arith.constant 0 : index
    %c0_110 = arith.constant 0 : index
    %229 = vector.load %arg2[%c0_108, %c0_109, %c0_110] : memref<4x16x16xf32, #tpu.memory_space<vmem>>, vector<1x16x16xf32>
    %230 = vector.shape_cast %229 : vector<1x16x16xf32> to vector<16x16xf32>
    %231 = arith.addf %228, %230 : vector<16x16xf32>
    %cst_111 = arith.constant dense<0xFF800000> : vector<16xf32>
    %232 = vector.multi_reduction <maximumf>, %231, %cst_111 [1] : vector<16x16xf32> to vector<16xf32>
    %233 = vector.shape_cast %232 : vector<16xf32> to vector<16x1xf32>
    %234 = vector.broadcast %233 : vector<16x1xf32> to vector<16x16xf32>
    %235 = arith.subf %231, %234 : vector<16x16xf32>
    %236 = math.exp %235 : vector<16x16xf32>
    %cst_112 = arith.constant dense<0.000000e+00> : vector<16xf32>
    %237 = vector.multi_reduction <add>, %236, %cst_112 [1] : vector<16x16xf32> to vector<16xf32>
    %238 = vector.shape_cast %237 : vector<16xf32> to vector<16x1xf32>
    %239 = arith.truncf %236 : vector<16x16xf32> to vector<16x16xbf16>
    %cst_113 = arith.constant dense<0.000000e+00> : vector<16x8xf32>
    %240 = tpu.matmul %239, %227, %cst_113 {dimension_numbers = #tpu.dot_dimension_numbers<[1], [0], [0], [1], [0, 0, 1, 1], [], []>} : vector<16x16xbf16>, vector<16x8xbf16>, vector<16x8xf32> -> vector<16x8xf32>
    %241 = tpu.reciprocal %238 {approx = true} : vector<16x1xf32> -> vector<16x1xf32>
    %242 = vector.broadcast %241 : vector<16x1xf32> to vector<16x8xf32>
    %243 = arith.mulf %240, %242 : vector<16x8xf32>
    %c0_114 = arith.constant 0 : index
    %c0_115 = arith.constant 0 : index
    %244 = vector.load %arg18[%c0_114, %c0_115] : memref<16x32xf32, #tpu.memory_space<vmem>>, vector<16x8xf32>
    tpu.vector_store %arg18[%c0_114, %c0_115], %243 {strides = array<i32>} : memref<16x32xf32, #tpu.memory_space<vmem>>, vector<16x8xf32>,
    %245 = vector.extract_strided_slice %224 {offsets = [0, 8], sizes = [16, 8], strides = [1, 1]} : vector<16x96xbf16> to vector<16x8xbf16>
    %246 = vector.extract_strided_slice %224 {offsets = [0, 40], sizes = [16, 8], strides = [1, 1]} : vector<16x96xbf16> to vector<16x8xbf16>
    %247 = vector.extract_strided_slice %224 {offsets = [0, 72], sizes = [16, 8], strides = [1, 1]} : vector<16x96xbf16> to vector<16x8xbf16>
    %cst_116 = arith.constant dense<0.000000e+00> : vector<16x16xf32>
    %248 = tpu.matmul %245, %246, %cst_116 {dimension_numbers = #tpu.dot_dimension_numbers<[1], [1], [0], [0], [0, 0, 1, 0], [], []>} : vector<16x8xbf16>, vector<16x8xbf16>, vector<16x16xf32> -> vector<16x16xf32>
    %c1_117 = arith.constant 1 : index
    %c0_118 = arith.constant 0 : index
    %c0_119 = arith.constant 0 : index
    %249 = vector.load %arg2[%c1_117, %c0_118, %c0_119] : memref<4x16x16xf32, #tpu.memory_space<vmem>>, vector<1x16x16xf32>
    %250 = vector.shape_cast %249 : vector<1x16x16xf32> to vector<16x16xf32>
    %251 = arith.addf %248, %250 : vector<16x16xf32>
    %cst_120 = arith.constant dense<0xFF800000> : vector<16xf32>
    %252 = vector.multi_reduction <maximumf>, %251, %cst_120 [1] : vector<16x16xf32> to vector<16xf32>
    %253 = vector.shape_cast %252 : vector<16xf32> to vector<16x1xf32>
    %254 = vector.broadcast %253 : vector<16x1xf32> to vector<16x16xf32>
    %255 = arith.subf %251, %254 : vector<16x16xf32>
    %256 = math.exp %255 : vector<16x16xf32>
    %cst_121 = arith.constant dense<0.000000e+00> : vector<16xf32>
    %257 = vector.multi_reduction <add>, %256, %cst_121 [1] : vector<16x16xf32> to vector<16xf32>
    %258 = vector.shape_cast %257 : vector<16xf32> to vector<16x1xf32>
    %259 = arith.truncf %256 : vector<16x16xf32> to vector<16x16xbf16>
    %cst_122 = arith.constant dense<0.000000e+00> : vector<16x8xf32>
    %260 = tpu.matmul %259, %247, %cst_122 {dimension_numbers = #tpu.dot_dimension_numbers<[1], [0], [0], [1], [0, 0, 1, 1], [], []>} : vector<16x16xbf16>, vector<16x8xbf16>, vector<16x8xf32> -> vector<16x8xf32>
    %261 = tpu.reciprocal %258 {approx = true} : vector<16x1xf32> -> vector<16x1xf32>
    %262 = vector.broadcast %261 : vector<16x1xf32> to vector<16x8xf32>
    %263 = arith.mulf %260, %262 : vector<16x8xf32>
    %c0_123 = arith.constant 0 : index
    %c8_124 = arith.constant 8 : index
    %264 = vector.load %arg18[%c0_123, %c8_124] : memref<16x32xf32, #tpu.memory_space<vmem>>, vector<16x8xf32>
    tpu.vector_store %arg18[%c0_123, %c8_124], %263 {strides = array<i32>} : memref<16x32xf32, #tpu.memory_space<vmem>>, vector<16x8xf32>,
    %265 = vector.extract_strided_slice %224 {offsets = [0, 16], sizes = [16, 8], strides = [1, 1]} : vector<16x96xbf16> to vector<16x8xbf16>
    %266 = vector.extract_strided_slice %224 {offsets = [0, 48], sizes = [16, 8], strides = [1, 1]} : vector<16x96xbf16> to vector<16x8xbf16>
    %267 = vector.extract_strided_slice %224 {offsets = [0, 80], sizes = [16, 8], strides = [1, 1]} : vector<16x96xbf16> to vector<16x8xbf16>
    %cst_125 = arith.constant dense<0.000000e+00> : vector<16x16xf32>
    %268 = tpu.matmul %265, %266, %cst_125 {dimension_numbers = #tpu.dot_dimension_numbers<[1], [1], [0], [0], [0, 0, 1, 0], [], []>} : vector<16x8xbf16>, vector<16x8xbf16>, vector<16x16xf32> -> vector<16x16xf32>
    %c2_126 = arith.constant 2 : index
    %c0_127 = arith.constant 0 : index
    %c0_128 = arith.constant 0 : index
    %269 = vector.load %arg2[%c2_126, %c0_127, %c0_128] : memref<4x16x16xf32, #tpu.memory_space<vmem>>, vector<1x16x16xf32>
    %270 = vector.shape_cast %269 : vector<1x16x16xf32> to vector<16x16xf32>
    %271 = arith.addf %268, %270 : vector<16x16xf32>
    %cst_129 = arith.constant dense<0xFF800000> : vector<16xf32>
    %272 = vector.multi_reduction <maximumf>, %271, %cst_129 [1] : vector<16x16xf32> to vector<16xf32>
    %273 = vector.shape_cast %272 : vector<16xf32> to vector<16x1xf32>
    %274 = vector.broadcast %273 : vector<16x1xf32> to vector<16x16xf32>
    %275 = arith.subf %271, %274 : vector<16x16xf32>
    %276 = math.exp %275 : vector<16x16xf32>
    %cst_130 = arith.constant dense<0.000000e+00> : vector<16xf32>
    %277 = vector.multi_reduction <add>, %276, %cst_130 [1] : vector<16x16xf32> to vector<16xf32>
    %278 = vector.shape_cast %277 : vector<16xf32> to vector<16x1xf32>
    %279 = arith.truncf %276 : vector<16x16xf32> to vector<16x16xbf16>
    %cst_131 = arith.constant dense<0.000000e+00> : vector<16x8xf32>
    %280 = tpu.matmul %279, %267, %cst_131 {dimension_numbers = #tpu.dot_dimension_numbers<[1], [0], [0], [1], [0, 0, 1, 1], [], []>} : vector<16x16xbf16>, vector<16x8xbf16>, vector<16x8xf32> -> vector<16x8xf32>
    %281 = tpu.reciprocal %278 {approx = true} : vector<16x1xf32> -> vector<16x1xf32>
    %282 = vector.broadcast %281 : vector<16x1xf32> to vector<16x8xf32>
    %283 = arith.mulf %280, %282 : vector<16x8xf32>
    %c0_132 = arith.constant 0 : index
    %c16_133 = arith.constant 16 : index
    %284 = vector.load %arg18[%c0_132, %c16_133] : memref<16x32xf32, #tpu.memory_space<vmem>>, vector<16x8xf32>
    tpu.vector_store %arg18[%c0_132, %c16_133], %283 {strides = array<i32>} : memref<16x32xf32, #tpu.memory_space<vmem>>, vector<16x8xf32>,
    %285 = vector.extract_strided_slice %224 {offsets = [0, 24], sizes = [16, 8], strides = [1, 1]} : vector<16x96xbf16> to vector<16x8xbf16>
    %286 = vector.extract_strided_slice %224 {offsets = [0, 56], sizes = [16, 8], strides = [1, 1]} : vector<16x96xbf16> to vector<16x8xbf16>
    %287 = vector.extract_strided_slice %224 {offsets = [0, 88], sizes = [16, 8], strides = [1, 1]} : vector<16x96xbf16> to vector<16x8xbf16>
    %cst_134 = arith.constant dense<0.000000e+00> : vector<16x16xf32>
    %288 = tpu.matmul %285, %286, %cst_134 {dimension_numbers = #tpu.dot_dimension_numbers<[1], [1], [0], [0], [0, 0, 1, 0], [], []>} : vector<16x8xbf16>, vector<16x8xbf16>, vector<16x16xf32> -> vector<16x16xf32>
    %c3_135 = arith.constant 3 : index
    %c0_136 = arith.constant 0 : index
    %c0_137 = arith.constant 0 : index
    %289 = vector.load %arg2[%c3_135, %c0_136, %c0_137] : memref<4x16x16xf32, #tpu.memory_space<vmem>>, vector<1x16x16xf32>
    %290 = vector.shape_cast %289 : vector<1x16x16xf32> to vector<16x16xf32>
    %291 = arith.addf %288, %290 : vector<16x16xf32>
    %cst_138 = arith.constant dense<0xFF800000> : vector<16xf32>
    %292 = vector.multi_reduction <maximumf>, %291, %cst_138 [1] : vector<16x16xf32> to vector<16xf32>
    %293 = vector.shape_cast %292 : vector<16xf32> to vector<16x1xf32>
    %294 = vector.broadcast %293 : vector<16x1xf32> to vector<16x16xf32>
    %295 = arith.subf %291, %294 : vector<16x16xf32>
    %296 = math.exp %295 : vector<16x16xf32>
    %cst_139 = arith.constant dense<0.000000e+00> : vector<16xf32>
    %297 = vector.multi_reduction <add>, %296, %cst_139 [1] : vector<16x16xf32> to vector<16xf32>
    %298 = vector.shape_cast %297 : vector<16xf32> to vector<16x1xf32>
    %299 = arith.truncf %296 : vector<16x16xf32> to vector<16x16xbf16>
    %cst_140 = arith.constant dense<0.000000e+00> : vector<16x8xf32>
    %300 = tpu.matmul %299, %287, %cst_140 {dimension_numbers = #tpu.dot_dimension_numbers<[1], [0], [0], [1], [0, 0, 1, 1], [], []>} : vector<16x16xbf16>, vector<16x8xbf16>, vector<16x8xf32> -> vector<16x8xf32>
    %301 = tpu.reciprocal %298 {approx = true} : vector<16x1xf32> -> vector<16x1xf32>
    %302 = vector.broadcast %301 : vector<16x1xf32> to vector<16x8xf32>
    %303 = arith.mulf %300, %302 : vector<16x8xf32>
    %c0_141 = arith.constant 0 : index
    %c24_142 = arith.constant 24 : index
    %304 = vector.load %arg18[%c0_141, %c24_142] : memref<16x32xf32, #tpu.memory_space<vmem>>, vector<16x8xf32>
    tpu.vector_store %arg18[%c0_141, %c24_142], %303 {strides = array<i32>} : memref<16x32xf32, #tpu.memory_space<vmem>>, vector<16x8xf32>,
    %c0_143 = arith.constant 0 : index
    %c0_144 = arith.constant 0 : index
    %305 = vector.load %arg18[%c0_143, %c0_144] : memref<16x32xf32, #tpu.memory_space<vmem>>, vector<16x32xf32>
    %306 = arith.truncf %305 : vector<16x32xf32> to vector<16x32xbf16>
    %c1_145 = arith.constant 1 : index
    %c0_146 = arith.constant 0 : index
    %c0_147 = arith.constant 0 : index
    %307 = vector.load %arg7[%c1_145, %c0_146, %c0_147] : memref<2x32x32xbf16, #tpu.memory_space<vmem>>, vector<1x32x32xbf16>
    %308 = vector.shape_cast %307 : vector<1x32x32xbf16> to vector<32x32xbf16>
    %cst_148 = arith.constant dense<0.000000e+00> : vector<16x32xf32>
    %309 = tpu.matmul %306, %308, %cst_148 {dimension_numbers = #tpu.dot_dimension_numbers<[1], [0], [0], [1], [0, 0, 1, 1], [], []>} : vector<16x32xbf16>, vector<32x32xbf16>, vector<16x32xf32> -> vector<16x32xf32>
    %c1_149 = arith.constant 1 : index
    %c0_150 = arith.constant 0 : index
    %c0_151 = arith.constant 0 : index
    %310 = vector.load %arg8[%c1_149, %c0_150, %c0_151] : memref<2x1x32xf32, #tpu.memory_space<vmem>>, vector<1x1x32xf32>
    %311 = vector.shape_cast %310 : vector<1x1x32xf32> to vector<1x32xf32>
    %312 = vector.broadcast %311 : vector<1x32xf32> to vector<16x32xf32>
    %313 = arith.addf %309, %312 : vector<16x32xf32>
    %314 = arith.addf %189, %313 : vector<16x32xf32>
    %c1_152 = arith.constant 1 : index
    %c0_153 = arith.constant 0 : index
    %c0_154 = arith.constant 0 : index
    %315 = vector.load %arg9[%c1_152, %c0_153, %c0_154] : memref<2x1x32xf32, #tpu.memory_space<vmem>>, vector<1x1x32xf32>
    %316 = vector.shape_cast %315 : vector<1x1x32xf32> to vector<1x32xf32>
    %c1_155 = arith.constant 1 : index
    %c0_156 = arith.constant 0 : index
    %c0_157 = arith.constant 0 : index
    %317 = vector.load %arg10[%c1_155, %c0_156, %c0_157] : memref<2x1x32xf32, #tpu.memory_space<vmem>>, vector<1x1x32xf32>
    %318 = vector.shape_cast %317 : vector<1x1x32xf32> to vector<1x32xf32>
    %cst_158 = arith.constant dense<0.000000e+00> : vector<16xf32>
    %319 = vector.multi_reduction <add>, %314, %cst_158 [1] : vector<16x32xf32> to vector<16xf32>
    %320 = vector.shape_cast %319 : vector<16xf32> to vector<16x1xf32>
    %cst_159 = arith.constant 3.200000e+01 : f32
    %321 = vector.broadcast %cst_159 : f32 to vector<16x1xf32>
    %322 = arith.divf %320, %321 : vector<16x1xf32>
    %323 = vector.broadcast %322 : vector<16x1xf32> to vector<16x32xf32>
    %324 = arith.subf %314, %323 : vector<16x32xf32>
    %325 = arith.mulf %324, %324 : vector<16x32xf32>
    %cst_160 = arith.constant dense<0.000000e+00> : vector<16xf32>
    %326 = vector.multi_reduction <add>, %325, %cst_160 [1] : vector<16x32xf32> to vector<16xf32>
    %327 = vector.shape_cast %326 : vector<16xf32> to vector<16x1xf32>
    %cst_161 = arith.constant 3.200000e+01 : f32
    %328 = vector.broadcast %cst_161 : f32 to vector<16x1xf32>
    %329 = arith.divf %327, %328 : vector<16x1xf32>
    %330 = vector.broadcast %322 : vector<16x1xf32> to vector<16x32xf32>
    %331 = arith.subf %314, %330 : vector<16x32xf32>
    %cst_162 = arith.constant 9.99999974E-6 : f32
    %332 = vector.broadcast %cst_162 : f32 to vector<16x1xf32>
    %333 = arith.addf %329, %332 : vector<16x1xf32>
    %334 = math.rsqrt %333 : vector<16x1xf32>
    %335 = vector.broadcast %334 : vector<16x1xf32> to vector<16x32xf32>
    %336 = arith.mulf %331, %335 : vector<16x32xf32>
    %337 = vector.broadcast %316 : vector<1x32xf32> to vector<16x32xf32>
    %338 = arith.mulf %336, %337 : vector<16x32xf32>
    %339 = vector.broadcast %318 : vector<1x32xf32> to vector<16x32xf32>
    %340 = arith.addf %338, %339 : vector<16x32xf32>
    %341 = arith.truncf %340 : vector<16x32xf32> to vector<16x32xbf16>
    %c1_163 = arith.constant 1 : index
    %c0_164 = arith.constant 0 : index
    %c0_165 = arith.constant 0 : index
    %342 = vector.load %arg11[%c1_163, %c0_164, %c0_165] : memref<2x32x128xbf16, #tpu.memory_space<vmem>>, vector<1x32x128xbf16>
    %343 = vector.shape_cast %342 : vector<1x32x128xbf16> to vector<32x128xbf16>
    %cst_166 = arith.constant dense<0.000000e+00> : vector<16x128xf32>
    %344 = tpu.matmul %341, %343, %cst_166 {dimension_numbers = #tpu.dot_dimension_numbers<[1], [0], [0], [1], [0, 0, 1, 1], [], []>} : vector<16x32xbf16>, vector<32x128xbf16>, vector<16x128xf32> -> vector<16x128xf32>
    %c1_167 = arith.constant 1 : index
    %c0_168 = arith.constant 0 : index
    %c0_169 = arith.constant 0 : index
    %345 = vector.load %arg12[%c1_167, %c0_168, %c0_169] : memref<2x1x128xf32, #tpu.memory_space<vmem>>, vector<1x1x128xf32>
    %346 = vector.shape_cast %345 : vector<1x1x128xf32> to vector<1x128xf32>
    %347 = vector.broadcast %346 : vector<1x128xf32> to vector<16x128xf32>
    %348 = arith.addf %344, %347 : vector<16x128xf32>
    %349 = arith.mulf %348, %348 : vector<16x128xf32>
    %350 = arith.mulf %348, %349 : vector<16x128xf32>
    %cst_170 = arith.constant 4.471500e-02 : f32
    %351 = vector.broadcast %cst_170 : f32 to vector<16x128xf32>
    %352 = arith.mulf %351, %350 : vector<16x128xf32>
    %353 = arith.addf %348, %352 : vector<16x128xf32>
    %cst_171 = arith.constant 0.797884583 : f32
    %354 = vector.broadcast %cst_171 : f32 to vector<16x128xf32>
    %355 = arith.mulf %354, %353 : vector<16x128xf32>
    %356 = math.tanh %355 : vector<16x128xf32>
    %cst_172 = arith.constant 1.000000e+00 : f32
    %357 = vector.broadcast %cst_172 : f32 to vector<16x128xf32>
    %358 = arith.addf %357, %356 : vector<16x128xf32>
    %cst_173 = arith.constant 5.000000e-01 : f32
    %359 = vector.broadcast %cst_173 : f32 to vector<16x128xf32>
    %360 = arith.mulf %359, %358 : vector<16x128xf32>
    %361 = arith.mulf %348, %360 : vector<16x128xf32>
    %362 = arith.truncf %361 : vector<16x128xf32> to vector<16x128xbf16>
    %c1_174 = arith.constant 1 : index
    %c0_175 = arith.constant 0 : index
    %c0_176 = arith.constant 0 : index
    %363 = vector.load %arg13[%c1_174, %c0_175, %c0_176] : memref<2x128x32xbf16, #tpu.memory_space<vmem>>, vector<1x128x32xbf16>
    %364 = vector.shape_cast %363 : vector<1x128x32xbf16> to vector<128x32xbf16>
    %cst_177 = arith.constant dense<0.000000e+00> : vector<16x32xf32>
    %365 = tpu.matmul %362, %364, %cst_177 {dimension_numbers = #tpu.dot_dimension_numbers<[1], [0], [0], [1], [0, 0, 1, 1], [], []>} : vector<16x128xbf16>, vector<128x32xbf16>, vector<16x32xf32> -> vector<16x32xf32>
    %c1_178 = arith.constant 1 : index
    %c0_179 = arith.constant 0 : index
    %c0_180 = arith.constant 0 : index
    %366 = vector.load %arg14[%c1_178, %c0_179, %c0_180] : memref<2x1x32xf32, #tpu.memory_space<vmem>>, vector<1x1x32xf32>
    %367 = vector.shape_cast %366 : vector<1x1x32xf32> to vector<1x32xf32>
    %368 = vector.broadcast %367 : vector<1x32xf32> to vector<16x32xf32>
    %369 = arith.addf %365, %368 : vector<16x32xf32>
    %370 = arith.addf %314, %369 : vector<16x32xf32>
    %c0_181 = arith.constant 0 : index
    %c0_182 = arith.constant 0 : index
    %371 = vector.load %arg15[%c0_181, %c0_182] : memref<1x32xf32, #tpu.memory_space<vmem>>, vector<1x32xf32>
    %c0_183 = arith.constant 0 : index
    %c0_184 = arith.constant 0 : index
    %372 = vector.load %arg16[%c0_183, %c0_184] : memref<1x32xf32, #tpu.memory_space<vmem>>, vector<1x32xf32>
    %cst_185 = arith.constant dense<0.000000e+00> : vector<16xf32>
    %373 = vector.multi_reduction <add>, %370, %cst_185 [1] : vector<16x32xf32> to vector<16xf32>
    %374 = vector.shape_cast %373 : vector<16xf32> to vector<16x1xf32>
    %cst_186 = arith.constant 3.200000e+01 : f32
    %375 = vector.broadcast %cst_186 : f32 to vector<16x1xf32>
    %376 = arith.divf %374, %375 : vector<16x1xf32>
    %377 = vector.broadcast %376 : vector<16x1xf32> to vector<16x32xf32>
    %378 = arith.subf %370, %377 : vector<16x32xf32>
    %379 = arith.mulf %378, %378 : vector<16x32xf32>
    %cst_187 = arith.constant dense<0.000000e+00> : vector<16xf32>
    %380 = vector.multi_reduction <add>, %379, %cst_187 [1] : vector<16x32xf32> to vector<16xf32>
    %381 = vector.shape_cast %380 : vector<16xf32> to vector<16x1xf32>
    %cst_188 = arith.constant 3.200000e+01 : f32
    %382 = vector.broadcast %cst_188 : f32 to vector<16x1xf32>
    %383 = arith.divf %381, %382 : vector<16x1xf32>
    %384 = vector.broadcast %376 : vector<16x1xf32> to vector<16x32xf32>
    %385 = arith.subf %370, %384 : vector<16x32xf32>
    %cst_189 = arith.constant 9.99999974E-6 : f32
    %386 = vector.broadcast %cst_189 : f32 to vector<16x1xf32>
    %387 = arith.addf %383, %386 : vector<16x1xf32>
    %388 = math.rsqrt %387 : vector<16x1xf32>
    %389 = vector.broadcast %388 : vector<16x1xf32> to vector<16x32xf32>
    %390 = arith.mulf %385, %389 : vector<16x32xf32>
    %391 = vector.broadcast %371 : vector<1x32xf32> to vector<16x32xf32>
    %392 = arith.mulf %390, %391 : vector<16x32xf32>
    %393 = vector.broadcast %372 : vector<1x32xf32> to vector<16x32xf32>
    %394 = arith.addf %392, %393 : vector<16x32xf32>
    %c0_190 = arith.constant 0 : index
    %c0_191 = arith.constant 0 : index
    %395 = vector.load %arg17[%c0_190, %c0_191] : memref<16x32xf32, #tpu.memory_space<vmem>>, vector<16x32xf32>
    tpu.vector_store %arg17[%c0_190, %c0_191], %394 {strides = array<i32>} : memref<16x32xf32, #tpu.memory_space<vmem>>, vector<16x32xf32>,
    return
  }
}

</mosaic_0001>

<bundles_post_ra>
// kernel: mpt_forward.1
= control target key start
LH: loop header
LB: loop body
LE: loop exit
PB: predicated region body
PF: predicated region fallthrough
CT: control target
= control target key end

     0   :  { %s3440_s0 = inlined_call_operand.vmem [shape: s32[16,1], index: 0, kind: input, shape index: {}]   ;;  %s3441_s1 = inlined_call_operand.vmem [shape: bf16[128,32], index: 1, kind: input, shape index: {}]   ;;  %s3442_s2 = inlined_call_operand.vmem [shape: f32[4,16,16], index: 2, kind: input, shape index: {}]   ;;  %s3443_s3 = inlined_call_operand.vmem [shape: f32[2,1,32], index: 3, kind: input, shape index: {}]   ;;  %s3444_s4 = inlined_call_operand.vmem [shape: f32[2,1,32], index: 4, kind: input, shape index: {}]   ;;  %s3445_s5 = inlined_call_operand.vmem [shape: bf16[2,32,96], index: 5, kind: input, shape index: {}]   ;;  %s3446_s6 = inlined_call_operand.vmem [shape: f32[2,1,96], index: 6, kind: input, shape index: {}]   ;;  %s3447_s7 = inlined_call_operand.vmem [shape: bf16[2,32,32], index: 7, kind: input, shape index: {}]   ;;  %s3448_s8 = inlined_call_operand.vmem [shape: f32[2,1,32], index: 8, kind: input, shape index: {}]   ;;  %s3449_s9 = inlined_call_operand.vmem [shape: f32[2,1,32], index: 9, kind: input, shape index: {}]   ;;  %s3450_s10 = inlined_call_operand.vmem [shape: f32[2,1,32], index: 10, kind: input, shape index: {}]   ;;  %s3451_s11 = inlined_call_operand.vmem [shape: bf16[2,32,128], index: 11, kind: input, shape index: {}]   ;;  %s3452_s12 = inlined_call_operand.vmem [shape: f32[2,1,128], index: 12, kind: input, shape index: {}]   ;;  %s3453_s13 = inlined_call_operand.vmem [shape: bf16[2,128,32], index: 13, kind: input, shape index: {}]   ;;  %s3454_s14 = inlined_call_operand.vmem [shape: f32[2,1,32], index: 14, kind: input, shape index: {}]   ;;  %s3455_s15 = inlined_call_operand.vmem [shape: f32[1,32], index: 15, kind: input, shape index: {}]   ;;  %s3456_s16 = inlined_call_operand.vmem [shape: f32[1,32], index: 16, kind: input, shape index: {}]   ;;  %s3457_s17 = inlined_call_operand.hbm [shape: f32[16,32], index: 17, kind: output, shape index: {}]  }
   0x1   :  { %3468 = sst [smem:[#allocation6_spill]] %s3440_s0 }
   0x2   :  { %3469 = sst [smem:[#allocation7_spill]] %s3441_s1 }
   0x3   :  { %s3470_s26 = sld [smem:[#allocation6_spill]]  ;;  %v2750_v1 = vmov 0   ;;  %v2751_v2 = vmov 0.0   ;;  %vm2752_vm0 = vmmov 0  }
   0x4   :  { %2599 = vset.pattern.permute.xlu0 %v2750_v1  ;;  %2375 = vmatprep.subr.bf16.mxu0 %v2751_v2  ;;  %s3471_s29 = sld [smem:[#allocation7_spill]] }
   0x5   :  { %2395 = vmatprep.subr.bf16.mxu1 %v2751_v2  ;;  %2391 = vmatprep.mubr.msk.bf16.mxu0 %vm2752_vm0, %v2751_v2 }
   0x6   :  { %2399 = vmatprep.mubr.msk.bf16.mxu1 %vm2752_vm0, %v2751_v2 }
   0x9   :  { %v58_v0 = vld [vmem:[%s3470_s26] sm:$0xff]  ;;  %v59_v4 = vld [vmem:[%s3470_s26 + $0x8] sm:$0xff] }
   0xa   :  { %v2600_v3 = vld [vmem:[%s3471_s29 + $0x38] sm:$0xff]   ;;  %63 = vperm.xlu0 %2599, %v58_v0   ;;  %v2601_v5 = vld [vmem:[%s3471_s29 + $0x30] sm:$0xff]   ;;  %v2602_v6 = vld [vmem:[%s3471_s29 + $0x28] sm:$0xff]  }
   0xb   :  { %2376 = vmatpush3.bf16.msra.mxu0 %v2600_v3  ;;  %v2603_v7 = vld [vmem:[%s3471_s29 + $0x20] sm:$0xff]   ;;  %v2604_v8 = vld [vmem:[%s3471_s29 + $0x18] sm:$0xff]   ;;  %v2605_v9 = vld [vmem:[%s3471_s29 + $0x10] sm:$0xff]  }
   0xc   :  { %2377 = vmatprep.subr.bf16.mxu0 %v2751_v2  ;;  %v2606_v10 = vld [vmem:[%s3471_s29 + $0x8] sm:$0xff]   ;;  %v2607_v11 = vld [vmem:[%s3471_s29] sm:$0xff]  }
   0xe   :  { %66 = vperm.xlu0 %2599, %v59_v4  }
   0xf   :  { %2378 = vmatpush3.bf16.msra.mxu0 %v2601_v5 }
  0x10   :  { %2379 = vmatprep.subr.bf16.mxu0 %v2751_v2 }
  0x13   :  { %2380 = vmatpush3.bf16.msra.mxu0 %v2602_v6 }
  0x14   :  { %2381 = vmatprep.subr.bf16.mxu0 %v2751_v2 }
  0x17   :  { %2382 = vmatpush3.bf16.msra.mxu0 %v2603_v7 }
  0x18   :  { %2383 = vmatprep.subr.bf16.mxu0 %v2751_v2 }
  0x1b   :  { %2384 = vmatpush3.bf16.msra.mxu0 %v2604_v8 }
  0x1c   :  { %2385 = vmatprep.subr.bf16.mxu0 %v2751_v2 }
  0x1f   :  { %2386 = vmatpush3.bf16.msra.mxu0 %v2605_v9 }
  0x20   :  { %2387 = vmatprep.subr.bf16.mxu0 %v2751_v2 }
  0x23   :  { %2388 = vmatpush3.bf16.msra.mxu0 %v2606_v10 }
  0x24   :  { %22 = vsyncpa [#allocation4], 0  ;;  %2389 = vmatprep.subr.bf16.mxu0 %v2751_v2  ;;  %v60_v12 = vlaneseq  ;;  %v2753_v16 = vmov 1.0|1.0   ;;  %vm182_vm4 = vcmask 261120   ;;  %v2608_v33 = vld [vmem:[%s3445_s5 + $0x8] sm:$0xff]  }
  0x25   :  { %2396 = vmatpush3.bf16.msra.mxu1 %v2608_v33  ;;  %v2609_v34 = vld [vmem:[%s3445_s5] sm:$0xff]   ;;  %s2754_s26 = smov 96   ;;  %vm300_vm5 = vcmask 64512   ;;  %vm348_vm6 = vcmask 130048   ;;  %v2957_v3 = vld [vmem:[%s3442_s2 + $0x8] sm:$0xff]  ;;  %s2755_s29 = smov 120  }
  0x26   :  { %v61_v14 = vand.u32 127, %v60_v12  ;;  %2397 = vmatprep.subr.bf16.mxu1 %v2751_v2  ;;  %v2182_v43 = vld [vmem:[%s3443_s3] ss:$0 sm:$0xff]  ;;  %s2756_s18 = smov 64   ;;  %s2757_s19 = smov 88   ;;  %vm553_vm7 = vcmask 130112  }
  0x27   :  { %2390 = vmatpush3.bf16.msra.mxu0 %v2607_v11  ;;  %v2183_v47 = vld [vmem:[%s3444_s4] ss:$0 sm:$0xff]  ;;  %s2758_s23 = smov 80   ;;  %s3467_s24 = smov 56   ;;  %vm688_vm8 = vcmask 195712   ;;  %vm823_vm9 = vcmask 261312  }
  0x28   :  { %2445 = vmatprep.subr.bf16.mxu0 %v2751_v2  ;;  %v2184_v53 = vld [vmem:[%s3446_s6] ss:$0 sm:$0xff]  ;;  %s2760_s25 = smov 112   ;;  %s2761_s1 = smov 72  }
  0x29   :  { %2398 = vmatpush3.bf16.msra.mxu1 %v2609_v34  ;;  %v2951_v62 = vld [vmem:[%s3442_s2] sm:$0xff]  ;;  %s2762_s20 = smov 48   ;;  %s2763_s21 = smov 104  }
  0x2a   :  { %2403 = vmatprep.subr.bf16.mxu1 %v2751_v2  ;;  %s3462_s30 = smov 8   ;;  %s3460_s22 = smov 16  }
  0x2b   :  { %s2768_s0 = smov [#allocation3]  }
  0x85   :  { %v64_v13 = vpop.permute.xlu0 %63 }
  0x86   :  { %vm68_vm1 = vcmp.eq.s32.totalorder %v61_v14, %v64_v13 }
  0x89   :  { %v67_v15 = vpop.permute.xlu0 %66 }
  0x8a   :  { %vm69_vm2 = vcmp.eq.s32.totalorder %v61_v14, %v67_v15 }
  0x8b   :  { %vm2180_vm3 = vmpackc.low %vm69_vm2, %vm68_vm1 }
  0x8c   :  { %2392 = vmatmul.mubr.msk.bf16.vlgmr.msra.gmra.mxu0 %vm2180_vm3, %v2753_v16 }
  0x8d   :  { %2447 = vmatprep.mubr.msk.bf16.mxu0 %vm2752_vm0, %v2751_v2 }
 0x14c   :  { %v2906_v17 = vpop.f32.mrf.mxu0 }
 0x14d   :  { %v183_v18 = vsel %vm182_vm4, %v2906_v17, 0.0 }
 0x14e   :  { %184 = vadd.xlane.f32.xlu1 %v183_v18  ;;  %v2393_v19 = vpop.f32.mrf.mxu0 }
 0x150   :  { %v2910_v20 = vpop.f32.mrf.mxu0 }
 0x151   :  { %v186_v21 = vsel %vm182_vm4, %v2910_v20, 0.0 }
 0x152   :  { %187 = vadd.xlane.f32.xlu1 %v186_v21  ;;  %v2394_v22 = vpop.f32.mrf.mxu0 }
 0x1d7   :  { %v185_v23 = vpop.xlane.xlu1 %184 }
 0x1d8   :  { %v190_v24 = vmul.f32 0.03125, %v185_v23 }
 0x1da   :  { %v192_v25 = vsub.f32 %v2906_v17, %v190_v24 }
 0x1db   :  { %v188_v26 = vpop.xlane.xlu1 %187 }
 0x1dc   :  { %v191_v27 = vmul.f32 0.03125, %v188_v26  ;;  %v194_v28 = vmul.f32 %v192_v25, %v192_v25 }
 0x1de   :  { %v193_v29 = vsub.f32 %v2910_v20, %v191_v27  ;;  %v196_v30 = vsel %vm182_vm4, %v194_v28, 0.0  ;;  %v2990_v28 = vld [vmem:[%s3442_s2 + $0x10] sm:$0xff] }
 0x1df   :  { %197 = vadd.xlane.f32.xlu0 %v196_v30 }
 0x1e0   :  { %v195_v31 = vmul.f32 %v193_v29, %v193_v29 }
 0x1e2   :  { %v199_v32 = vsel %vm182_vm4, %v195_v31, 0.0 }
 0x1e3   :  { %200 = vadd.xlane.f32.xlu1 %v199_v32  ;;  %v2996_v32 = vld [vmem:[%s3442_s2 + $0x18] sm:$0xff] }
 0x268   :  { %v198_v35 = vpop.xlane.xlu0 %197 }
 0x269   :  { %v202_v36 = vmul.f32 0.03125, %v198_v35 }
 0x26b   :  { %v204_v37 = vadd.f32 1e-05, %v202_v36 }
 0x26c   :  { %v201_v38 = vpop.xlane.xlu1 %200 }
 0x26d   :  { %2636 = vrsqrt.f32 %v204_v37  ;;  %v203_v39 = vmul.f32 0.03125, %v201_v38 }
 0x26f   :  { %v205_v40 = vadd.f32 1e-05, %v203_v39 }
 0x271   :  { %2638 = vrsqrt.f32 %v205_v40 }
 0x27a   :  { %v2637_v41 = vpop.eup %2636 }
 0x27b   :  { %v208_v42 = vmul.f32 %v2637_v41, %v192_v25 }
 0x27d   :  { %v216_v46 = vmul.f32 %v2182_v43, %v208_v42 }
 0x27e   :  { %v2639_v44 = vpop.eup %2638 }
 0x27f   :  { %v209_v45 = vmul.f32 %v2639_v44, %v193_v29  ;;  %v224_v49 = vadd.f32 %v2183_v47, %v216_v46 }
 0x281   :  { %v217_v48 = vmul.f32 %v2182_v43, %v209_v45 }
 0x283   :  { %v225_v50 = vadd.f32 %v2183_v47, %v217_v48 }
 0x285   :  { %v226_v51 = vpack.c.bf16 %v225_v50, %v224_v49 }
 0x287   :  { %2400 = vmatmul.mubr.msk.bf16.vlgmr.msra.gmra.mxu1 %vm182_vm4, %v226_v51 }
 0x288   :  { %2405 = vmatprep.mubr.msk.bf16.mxu1 %vm2752_vm0, %v2751_v2 }
 0x347   :  { %v287_v52 = vpop.f32.mrf.mxu1 }
 0x348   :  { %v288_v56 = vadd.f32 %v2184_v53, %v287_v52 }
 0x349   :  { %v2401_v54 = vpop.f32.mrf.mxu1 }
 0x34b   :  { %v290_v55 = vpop.f32.mrf.mxu1 }
 0x34c   :  { %v291_v57 = vadd.f32 %v2184_v53, %v290_v55  ;;  %v3029_v55 = vld [vmem:[%s3442_s2 + $0x20] sm:$0xff] }
 0x34d   :  { %v2402_v58 = vpop.f32.mrf.mxu1 }
 0x34e   :  { %v2938_v59 = vpack.c.bf16 %v291_v57, %v288_v56 }
 0x350   :  { %298 = vrot.lane.b32.xlu1 %v2938_v59, %s2754_s26 }
 0x3c2   :  { %v299_v60 = vpop.permute.xlu1 %298 }
 0x3c3   :  { %v305_v61 = vsel %vm300_vm5, %v299_v60, 0  ;;  %v3035_v60 = vld [vmem:[%s3442_s2 + $0x28] sm:$0xff] }
 0x3c4   :  { %2404 = vmatpush3.bf16.xpose.msra.mxu1 %v305_v61 }
 0x3c5   :  { %2409 = vmatprep.subr.bf16.mxu1 %v2751_v2 }
 0x3cb   :  { %2406 = vmatmul.mubr.msk.bf16.vlgmr.msra.gmra.mxu1 %vm300_vm5, %v2938_v59 }
 0x3cc   :  { %2411 = vmatprep.mubr.msk.bf16.mxu1 %vm2752_vm0, %v2751_v2 }
 0x48b   :  { %v341_v63 = vpop.f32.mrf.mxu1 }
 0x48c   :  { %v342_v0 = vadd.f32 %v341_v63, %v2951_v62 }
 0x48d   :  { %v2407_v1 = vpop.f32.mrf.mxu1 }
 0x48e   :  { %v349_v4 = vsel %vm348_vm6, %v342_v0, -inf }
 0x48f   :  { %350 = vmax.xlane.f32.xlu1 %v349_v4  ;;  %v344_v5 = vpop.f32.mrf.mxu1 }
 0x490   :  { %v345_v6 = vadd.f32 %v344_v5, %v2957_v3 }
 0x491   :  { %v2408_v7 = vpop.f32.mrf.mxu1 }
 0x492   :  { %v352_v8 = vsel %vm348_vm6, %v345_v6, -inf }
 0x493   :  { %353 = vmax.xlane.f32.xlu0 %v352_v8 }
 0x4a0   :  { %424 = vrot.lane.b32.xlu1 %v2938_v59, %s2755_s29 }
 0x4a9   :  { %368 = vrot.lane.b32.xlu0 %v2938_v59, %s2756_s18 }
 0x4ad   :  { %426 = vrot.lane.b32.xlu0 %v2938_v59, %s2757_s19 }
 0x518   :  { %v351_v9 = vpop.xlane.xlu1 %350 }
 0x519   :  { %v355_v10 = vsub.f32 %v342_v0, %v351_v9 }
 0x51b   :  { %v357_v11 = vmul.f32 1.442695, %v355_v10 }
 0x51c   :  { %v354_v12 = vpop.xlane.xlu0 %353  ;;  %v425_v23 = vpop.permute.xlu1 %424 }
 0x51d   :  { %v356_v13 = vsub.f32 %v345_v6, %v354_v12  ;;  %2640 = vpow2.f32 %v357_v11 }
 0x51f   :  { %v359_v14 = vmul.f32 1.442695, %v356_v13 }
 0x520   :  { %v369_v15 = vpop.permute.xlu0 %368 }
 0x521   :  { %2642 = vpow2.f32 %v359_v14  ;;  %2410 = vmatpush3.bf16.msra.mxu1 %v369_v15 }
 0x522   :  { %2415 = vmatprep.subr.bf16.mxu1 %v2751_v2 }
 0x524   :  { %v427_v19 = vpop.permute.xlu0 %426 }
 0x525   :  { %v432_v22 = vsel %vm300_vm5, %v427_v19, 0 }
 0x52a   :  { %v2969_v16 = vpop.eup %2640 }
 0x52e   :  { %v2971_v18 = vpop.eup %2642 }
 0x52f   :  { %v367_v21 = vpack.c.bf16 %v2971_v18, %v2969_v16 }
 0x531   :  { %2412 = vmatmul.mubr.msk.bf16.vlgmr.msra.gmra.mxu1 %vm348_vm6, %v367_v21 }
 0x532   :  { %2416 = vmatpush3.bf16.xpose.msra.mxu1 %v432_v22  ;;  %2417 = vmatprep.mubr.msk.bf16.mxu1 %vm2752_vm0, %v2751_v2 }
 0x533   :  { %2421 = vmatprep.subr.bf16.mxu1 %v2751_v2 }
 0x539   :  { %2418 = vmatmul.mubr.msk.bf16.vlgmr.msra.gmra.mxu1 %vm300_vm5, %v425_v23 }
 0x53a   :  { %2423 = vmatprep.mubr.msk.bf16.mxu1 %vm2752_vm0, %v2751_v2 }
 0x5f1   :  { %v2983_v24 = vpop.f32.mrf.mxu1 }
 0x5f3   :  { %v2413_v25 = vpop.f32.mrf.mxu1 }
 0x5f5   :  { %v2985_v26 = vpop.f32.mrf.mxu1 }
 0x5f7   :  { %v2414_v27 = vpop.f32.mrf.mxu1 }
 0x5f9   :  { %v468_v29 = vpop.f32.mrf.mxu1 }
 0x5fa   :  { %v469_v30 = vadd.f32 %v2990_v28, %v468_v29  ;;  %v3062_v29 = vld [vmem:[%s3442_s2 + $0x30] sm:$0xff] }
 0x5fb   :  { %v2419_v31 = vpop.f32.mrf.mxu1 }
 0x5fc   :  { %v475_v33 = vsel %vm348_vm6, %v469_v30, -inf }
 0x5fd   :  { %476 = vmax.xlane.f32.xlu0 %v475_v33  ;;  %v471_v34 = vpop.f32.mrf.mxu1 }
 0x5fe   :  { %v472_v35 = vadd.f32 %v2996_v32, %v471_v34  ;;  %v3068_v34 = vld [vmem:[%s3442_s2 + $0x38] sm:$0xff]  ;;  %s3466_s2 = smov 40  }
 0x5ff   :  { %v2420_v36 = vpop.f32.mrf.mxu1 }
 0x600   :  { %v478_v37 = vsel %vm348_vm6, %v472_v35, -inf }
 0x601   :  { %479 = vmax.xlane.f32.xlu1 %v478_v37 }
 0x612   :  { %561 = vrot.lane.b32.xlu1 %v2938_v59, %s2758_s23 }
 0x613   :  { %494 = vrot.lane.b32.xlu0 %v2938_v59, %s3467_s24 }
 0x617   :  { %559 = vrot.lane.b32.xlu0 %v2938_v59, %s2760_s25 }
 0x686   :  { %v477_v38 = vpop.xlane.xlu0 %476 }
 0x687   :  { %v481_v39 = vsub.f32 %v469_v30, %v477_v38 }
 0x689   :  { %v483_v40 = vmul.f32 1.442695, %v481_v39 }
 0x68a   :  { %v495_v41 = vpop.permute.xlu0 %494  ;;  %v480_v42 = vpop.xlane.xlu1 %479 }
 0x68b   :  { %v482_v43 = vsub.f32 %v472_v35, %v480_v42  ;;  %2422 = vmatpush3.bf16.msra.mxu1 %v495_v41  ;;  %2644 = vpow2.f32 %v483_v40 }
 0x68c   :  { %2427 = vmatprep.subr.bf16.mxu1 %v2751_v2 }
 0x68d   :  { %v485_v44 = vmul.f32 1.442695, %v482_v43 }
 0x68e   :  { %v562_v47 = vpop.permute.xlu1 %561  ;;  %v560_v50 = vpop.permute.xlu0 %559 }
 0x68f   :  { %2646 = vpow2.f32 %v485_v44  ;;  %v567_v49 = vsel %vm300_vm5, %v562_v47, 0 }
 0x698   :  { %v3008_v45 = vpop.eup %2644 }
 0x699   :  { %v487_v40 = vsel %vm348_vm6, %v3008_v45, 0.0 }
 0x69c   :  { %v3010_v46 = vpop.eup %2646 }
 0x69d   :  { %v493_v48 = vpack.c.bf16 %v3010_v46, %v3008_v45  ;;  %v490_v41 = vsel %vm348_vm6, %v3010_v46, 0.0 }
 0x69f   :  { %2424 = vmatmul.mubr.msk.bf16.vlgmr.msra.gmra.mxu1 %vm348_vm6, %v493_v48 }
 0x6a0   :  { %2428 = vmatpush3.bf16.xpose.msra.mxu1 %v567_v49  ;;  %2429 = vmatprep.mubr.msk.bf16.mxu1 %vm2752_vm0, %v2751_v2 }
 0x6a1   :  { %2433 = vmatprep.subr.bf16.mxu1 %v2751_v2 }
 0x6a7   :  { %2430 = vmatmul.mubr.msk.bf16.vlgmr.msra.gmra.mxu1 %vm300_vm5, %v560_v50 }
 0x6a8   :  { %2435 = vmatprep.mubr.msk.bf16.mxu1 %vm2752_vm0, %v2751_v2 }
 0x75f   :  { %v3022_v51 = vpop.f32.mrf.mxu1 }
 0x761   :  { %v2425_v52 = vpop.f32.mrf.mxu1 }
 0x763   :  { %v3024_v53 = vpop.f32.mrf.mxu1 }
 0x765   :  { %v2426_v54 = vpop.f32.mrf.mxu1 }
 0x767   :  { %v603_v56 = vpop.f32.mrf.mxu1 }
 0x768   :  { %v604_v57 = vadd.f32 %v3029_v55, %v603_v56 }
 0x769   :  { %v2431_v58 = vpop.f32.mrf.mxu1 }
 0x76a   :  { %v610_v61 = vsel %vm348_vm6, %v604_v57, -inf }
 0x76b   :  { %611 = vmax.xlane.f32.xlu0 %v610_v61  ;;  %v606_v63 = vpop.f32.mrf.mxu1 }
 0x76c   :  { %v607_v0 = vadd.f32 %v3035_v60, %v606_v63 }
 0x76d   :  { %v2432_v1 = vpop.f32.mrf.mxu1 }
 0x76e   :  { %v613_v4 = vsel %vm348_vm6, %v607_v0, -inf }
 0x76f   :  { %614 = vmax.xlane.f32.xlu1 %v613_v4  ;;  %v364_v4 = vsel %vm348_vm6, %v2971_v18, 0.0 }
 0x780   :  { %696 = vrot.lane.b32.xlu1 %v2938_v59, %s2761_s1 }
 0x781   :  { %629 = vrot.lane.b32.xlu0 %v2938_v59, %s2762_s20 }
 0x785   :  { %694 = vrot.lane.b32.xlu0 %v2938_v59, %s2763_s21 }
 0x7f4   :  { %v612_v5 = vpop.xlane.xlu0 %611 }
 0x7f5   :  { %v616_v6 = vsub.f32 %v604_v57, %v612_v5 }
 0x7f7   :  { %v618_v7 = vmul.f32 1.442695, %v616_v6 }
 0x7f8   :  { %v630_v8 = vpop.permute.xlu0 %629  ;;  %v615_v9 = vpop.xlane.xlu1 %614 }
 0x7f9   :  { %v617_v10 = vsub.f32 %v607_v0, %v615_v9  ;;  %2434 = vmatpush3.bf16.msra.mxu1 %v630_v8  ;;  %2648 = vpow2.f32 %v618_v7  ;;  %v361_v0 = vsel %vm348_vm6, %v2969_v16, 0.0 }
 0x7fa   :  { %2439 = vmatprep.subr.bf16.mxu1 %v2751_v2 }
 0x7fb   :  { %v620_v11 = vmul.f32 1.442695, %v617_v10 }
 0x7fc   :  { %v697_v14 = vpop.permute.xlu1 %696  ;;  %v695_v21 = vpop.permute.xlu0 %694 }
 0x7fd   :  { %2650 = vpow2.f32 %v620_v11  ;;  %v702_v19 = vsel %vm300_vm5, %v697_v14, 0 }
 0x806   :  { %v2649_v12 = vpop.eup %2648 }
 0x807   :  { %v622_v42 = vsel %vm348_vm6, %v2649_v12, 0.0 }
 0x80a   :  { %v2651_v13 = vpop.eup %2650 }
 0x80b   :  { %v628_v15 = vpack.c.bf16 %v2651_v13, %v2649_v12  ;;  %v625_v43 = vsel %vm348_vm6, %v2651_v13, 0.0 }
 0x80d   :  { %2436 = vmatmul.mubr.msk.bf16.vlgmr.msra.gmra.mxu1 %vm348_vm6, %v628_v15 }
 0x80e   :  { %2440 = vmatpush3.bf16.xpose.msra.mxu1 %v702_v19  ;;  %2441 = vmatprep.mubr.msk.bf16.mxu1 %vm2752_vm0, %v2751_v2 }
 0x80f   :  { %2451 = vmatprep.subr.bf16.mxu1 %v2751_v2 }
 0x815   :  { %2442 = vmatmul.mubr.msk.bf16.vlgmr.msra.gmra.mxu1 %vm300_vm5, %v695_v21 }
 0x816   :  { %2455 = vmatprep.mubr.msk.bf16.mxu1 %vm2752_vm0, %v2751_v2 }
 0x8cd   :  { %v3055_v22 = vpop.f32.mrf.mxu1 }
 0x8cf   :  { %v2437_v23 = vpop.f32.mrf.mxu1 }
 0x8d1   :  { %v3057_v25 = vpop.f32.mrf.mxu1 }
 0x8d3   :  { %v2438_v27 = vpop.f32.mrf.mxu1 }
 0x8d4   :  { %v2611_v27 = vld [vmem:[%s3447_s7] sm:$0xff]  }
 0x8d5   :  { %v738_v30 = vpop.f32.mrf.mxu1 }
 0x8d6   :  { %v739_v31 = vadd.f32 %v3062_v29, %v738_v30 }
 0x8d7   :  { %v2443_v33 = vpop.f32.mrf.mxu1 }
 0x8d8   :  { %v745_v35 = vsel %vm348_vm6, %v739_v31, -inf }
 0x8d9   :  { %746 = vmax.xlane.f32.xlu0 %v745_v35  ;;  %v741_v36 = vpop.f32.mrf.mxu1 }
 0x8da   :  { %v742_v37 = vadd.f32 %v3068_v34, %v741_v36 }
 0x8db   :  { %v2444_v38 = vpop.f32.mrf.mxu1 }
 0x8dc   :  { %v748_v39 = vsel %vm348_vm6, %v742_v37, -inf }
 0x8dd   :  { %749 = vmax.xlane.f32.xlu1 %v748_v39 }
 0x8e1   :  { %488 = vadd.xlane.f32.xlu1 %v487_v40 }
 0x8e5   :  { %491 = vadd.xlane.f32.xlu1 %v490_v41 }
 0x8e9   :  { %623 = vadd.xlane.f32.xlu1 %v622_v42 }
 0x8ef   :  { %764 = vrot.lane.b32.xlu0 %v2938_v59, %s3466_s2 }
 0x90e   :  { %626 = vadd.xlane.f32.xlu0 %v625_v43 }
 0x962   :  { %v747_v44 = vpop.xlane.xlu0 %746 }
 0x963   :  { %v751_v47 = vsub.f32 %v739_v31, %v747_v44  ;;  %v2202_v44 = vld [vmem:[%s3448_s8] ss:$0 sm:$0xff] }
 0x965   :  { %v753_v48 = vmul.f32 1.442695, %v751_v47 }
 0x966   :  { %v765_v49 = vpop.permute.xlu0 %764  ;;  %v750_v45 = vpop.xlane.xlu1 %749 }
 0x967   :  { %2652 = vpow2.f32 %v753_v48  ;;  %v752_v50 = vsub.f32 %v742_v37, %v750_v45  ;;  %2446 = vmatpush3.bf16.msra.mxu0 %v765_v49 }
 0x968   :  { %2459 = vmatprep.subr.bf16.mxu0 %v2751_v2 }
 0x969   :  { %v755_v46 = vmul.f32 1.442695, %v752_v50 }
 0x96a   :  { %v489_v52 = vpop.xlane.xlu1 %488 }
 0x96b   :  { %2654 = vpow2.f32 %v755_v46 }
 0x96e   :  { %v492_v54 = vpop.xlane.xlu1 %491 }
 0x96f   :  { %2656 = vrcp.f32 %v492_v54 }
 0x970   :  { %2658 = vrcp.f32 %v489_v52 }
 0x972   :  { %v624_v5 = vpop.xlane.xlu1 %623 }
 0x973   :  { %2660 = vrcp.f32 %v624_v5 }
 0x974   :  { %v2653_v56 = vpop.eup %2652 }
 0x975   :  { %v757_v59 = vsel %vm348_vm6, %v2653_v56, 0.0 }
 0x976   :  { %758 = vadd.xlane.f32.xlu1 %v757_v59 }
 0x978   :  { %v2655_v57 = vpop.eup %2654 }
 0x979   :  { %v760_v58 = vsel %vm348_vm6, %v2655_v57, 0.0  ;;  %v763_v61 = vpack.c.bf16 %v2655_v57, %v2653_v56 }
 0x97a   :  { %761 = vadd.xlane.f32.xlu1 %v760_v58 }
 0x97b   :  { %2448 = vmatmul.mubr.msk.bf16.vlgmr.msra.gmra.mxu0 %vm348_vm6, %v763_v61 }
 0x97c   :  { %v2657_v63 = vpop.eup %2656  ;;  %2463 = vmatprep.mubr.msk.bf16.mxu0 %vm2752_vm0, %v2751_v2 }
 0x97d   :  { %v544_v1 = vmul.f32 %v2657_v63, %v3024_v53  ;;  %v2659_v6 = vpop.eup %2658 }
 0x97e   :  { %362 = vadd.xlane.f32.xlu1 %v361_v0  ;;  %v543_v7 = vmul.f32 %v2659_v6, %v3022_v51  ;;  %v2612_v6 = vld [vmem:[%s3451_s11 + $0x8] sm:$0xff]  }
 0x97f   :  { %549 = vrot.lane.b32.xlu0 %v544_v1, %s3462_s30  ;;  %2460 = vmatpush3.bf16.msra.mxu0 %v2612_v6  ;;  %v2212_v6 = vld [vmem:[%s3454_s14] ss:$0 sm:$0xff] }
 0x980   :  { %v2661_v8 = vpop.eup %2660  ;;  %2461 = vmatprep.subr.bf16.mxu0 %v2751_v2 }
 0x981   :  { %v678_v16 = vmul.f32 %v2661_v8, %v3055_v22 }
 0x982   :  { %365 = vadd.xlane.f32.xlu1 %v364_v4 }
 0x993   :  { %547 = vrot.lane.b32.xlu1 %v543_v7, %s3462_s30  ;;  %s3464_s30 = smov 24   ;;  %v2613_v7 = vld [vmem:[%s3451_s11] sm:$0xff]  }
 0x994   :  { %2462 = vmatpush3.bf16.msra.mxu0 %v2613_v7 }
 0x995   :  { %2487 = vmatprep.subr.bf16.mxu0 %v2751_v2 }
 0x997   :  { %v627_v53 = vpop.xlane.xlu0 %626  ;;  %682 = vrot.lane.b32.xlu1 %v678_v16, %s3460_s22 }
 0x998   :  { %2662 = vrcp.f32 %v627_v53 }
 0x9a5   :  { %v2663_v9 = vpop.eup %2662 }
 0x9a6   :  { %v679_v10 = vmul.f32 %v2663_v9, %v3057_v25 }
 0x9a8   :  { %684 = vrot.lane.b32.xlu1 %v679_v10, %s3460_s22 }
 0x9f1   :  { %v550_v23 = vpop.permute.xlu0 %549 }
 0x9ff   :  { %v759_v18 = vpop.xlane.xlu1 %758 }
 0xa03   :  { %v762_v11 = vpop.xlane.xlu1 %761 }
 0xa07   :  { %v363_v12 = vpop.xlane.xlu1 %362 }
 0xa08   :  { %2664 = vrcp.f32 %v363_v12 }
 0xa0b   :  { %v366_v51 = vpop.xlane.xlu1 %365 }
 0xa0c   :  { %2666 = vrcp.f32 %v366_v51  ;;  %v2206_v51 = vld [vmem:[%s3449_s9] ss:$0 sm:$0xff] }
 0xa0d   :  { %2668 = vrcp.f32 %v759_v18 }
 0xa0e   :  { %2670 = vrcp.f32 %v762_v11 }
 0xa0f   :  { %v548_v13 = vpop.permute.xlu1 %547 }
 0xa13   :  { %v683_v21 = vpop.permute.xlu1 %682 }
 0xa15   :  { %v2665_v14 = vpop.eup %2664 }
 0xa16   :  { %v417_v15 = vmul.f32 %v2665_v14, %v2983_v24  ;;  %v2610_v24 = vld [vmem:[%s3447_s7 + $0x8] sm:$0xff]  }
 0xa17   :  { %2452 = vmatpush3.bf16.msra.mxu1 %v2610_v24  ;;  %v2614_v24 = vld [vmem:[%s3453_s13 + $0x38] sm:$0xff]  }
 0xa18   :  { %419 = vst.msk [vmem:[#allocation2] sm:$0xff] %vm300_vm5, %v417_v15  ;;  %2453 = vmatprep.subr.bf16.mxu1 %v2751_v2 }
 0xa19   :  { %v2667_v19 = vpop.eup %2666  ;;  %554 = vst.msk [vmem:[#allocation2] sm:$0xff] %vm553_vm7, %v548_v13 }
 0xa1a   :  { %689 = vst.msk [vmem:[#allocation2] sm:$0xff] %vm688_vm8, %v683_v21  ;;  %v418_v22 = vmul.f32 %v2667_v19, %v2985_v26  ;;  %v685_v25 = vpop.permute.xlu1 %684  ;;  %v2669_v26 = vpop.eup %2668  ;;  %v2207_v19 = vld [vmem:[%s3450_s10] ss:$0 sm:$0xff] }
 0xa1b   :  { %2454 = vmatpush3.bf16.msra.mxu1 %v2611_v27  ;;  %v2671_v35 = vpop.eup %2670  ;;  %v2615_v27 = vld [vmem:[%s3453_s13 + $0x30] sm:$0xff]  }
 0xa1c   :  { %420 = vst.msk [vmem:[#allocation2 + $0x8] sm:$0xff] %vm300_vm5, %v418_v22  ;;  %2467 = vmatprep.subr.bf16.mxu1 %v2751_v2 }
 0xa1d   :  { %555 = vst.msk [vmem:[#allocation2 + $0x8] sm:$0xff] %vm553_vm7, %v550_v23 }
 0xa1e   :  { %690 = vst.msk [vmem:[#allocation2 + $0x8] sm:$0xff] %vm688_vm8, %v685_v25 }
 0xa3b   :  { %v804_v30 = vpop.f32.mrf.mxu0 }
 0xa3c   :  { %v813_v31 = vmul.f32 %v2669_v26, %v804_v30  ;;  %v2616_v26 = vld [vmem:[%s3453_s13 + $0x28] sm:$0xff]   ;;  %v2617_v30 = vld [vmem:[%s3453_s13 + $0x20] sm:$0xff]  }
 0xa3d   :  { %v2449_v33 = vpop.f32.mrf.mxu0 }
 0xa3e   :  { %817 = vrot.lane.b32.xlu1 %v813_v31, %s3464_s30  ;;  %v2618_v31 = vld [vmem:[%s3453_s13 + $0x18] sm:$0xff]   ;;  %v2619_v33 = vld [vmem:[%s3453_s13 + $0x10] sm:$0xff]  }
 0xa3f   :  { %v807_v36 = vpop.f32.mrf.mxu0 }
 0xa40   :  { %v814_v37 = vmul.f32 %v2671_v35, %v807_v36  ;;  %v2620_v35 = vld [vmem:[%s3453_s13 + $0x8] sm:$0xff]   ;;  %v2621_v36 = vld [vmem:[%s3453_s13] sm:$0xff]  }
 0xa41   :  { %v2450_v38 = vpop.f32.mrf.mxu0 }
 0xa42   :  { %819 = vrot.lane.b32.xlu1 %v814_v37, %s3464_s30  ;;  %v2208_v37 = vld [vmem:[%s3452_s12] ss:$0 sm:$0xff] }
 0xab0   :  { %v818_v39 = vpop.permute.xlu1 %817 }
 0xab1   :  { %824 = vst.msk [vmem:[#allocation2] sm:$0xff] %vm823_vm9, %v818_v39 }
 0xab4   :  { %v820_v40 = vpop.permute.xlu1 %819 }
 0xab5   :  { %825 = vst.msk [vmem:[#allocation2 + $0x8] sm:$0xff] %vm823_vm9, %v820_v40 }
 0xab8   :  { %v826_v41 = vld [vmem:[#allocation2] sm:$0xff] }
 0xabc   :  { %v827_v42 = vld [vmem:[#allocation2 + $0x8] sm:$0xff] }
 0xabd   :  { %v828_v43 = vpack.c.bf16 %v827_v42, %v826_v41 }
 0xabf   :  { %2456 = vmatmul.mubr.msk.bf16.vlgmr.msra.gmra.mxu1 %vm182_vm4, %v828_v43 }
 0xac0   :  { %2483 = vmatprep.mubr.msk.bf16.mxu1 %vm2752_vm0, %v2751_v2  ;;  %2468 = vmatpush3.bf16.msra.mxu1 %v2614_v24  ;;  %v2622_v24 = vld [vmem:[%s3445_s5 + $0x18] sm:$0xff]  }
 0xac1   :  { %2469 = vmatprep.subr.bf16.mxu1 %v2751_v2 }
 0xac4   :  { %2470 = vmatpush3.bf16.msra.mxu1 %v2615_v27  ;;  %v2623_v27 = vld [vmem:[%s3445_s5 + $0x10] sm:$0xff]  }
 0xac5   :  { %2471 = vmatprep.subr.bf16.mxu1 %v2751_v2 }
 0xac8   :  { %2472 = vmatpush3.bf16.msra.mxu1 %v2616_v26 }
 0xac9   :  { %2473 = vmatprep.subr.bf16.mxu1 %v2751_v2 }
 0xacc   :  { %2474 = vmatpush3.bf16.msra.mxu1 %v2617_v30 }
 0xacd   :  { %2475 = vmatprep.subr.bf16.mxu1 %v2751_v2 }
 0xad0   :  { %2476 = vmatpush3.bf16.msra.mxu1 %v2618_v31 }
 0xad1   :  { %2477 = vmatprep.subr.bf16.mxu1 %v2751_v2 }
 0xad4   :  { %2478 = vmatpush3.bf16.msra.mxu1 %v2619_v33 }
 0xad5   :  { %2479 = vmatprep.subr.bf16.mxu1 %v2751_v2 }
 0xad8   :  { %2480 = vmatpush3.bf16.msra.mxu1 %v2620_v35 }
 0xad9   :  { %2481 = vmatprep.subr.bf16.mxu1 %v2751_v2 }
 0xadc   :  { %2482 = vmatpush3.bf16.msra.mxu1 %v2621_v36 }
 0xadd   :  { %2513 = vmatprep.subr.bf16.mxu1 %v2751_v2 }
 0xb7f   :  { %v889_v47 = vpop.f32.mrf.mxu1 }
 0xb80   :  { %v890_v48 = vadd.f32 %v2202_v44, %v889_v47 }
 0xb81   :  { %v2457_v49 = vpop.f32.mrf.mxu1 }
 0xb82   :  { %v3126_v45 = vadd.f32 %v890_v48, %v2906_v17 }
 0xb83   :  { %v892_v50 = vpop.f32.mrf.mxu1 }
 0xb84   :  { %v893_v46 = vadd.f32 %v2202_v44, %v892_v50  ;;  %v900_v52 = vsel %vm182_vm4, %v3126_v45, 0.0 }
 0xb85   :  { %901 = vadd.xlane.f32.xlu1 %v900_v52  ;;  %v2458_v54 = vpop.f32.mrf.mxu1 }
 0xb86   :  { %v3131_v56 = vadd.f32 %v893_v46, %v2910_v20 }
 0xb88   :  { %v903_v59 = vsel %vm182_vm4, %v3131_v56, 0.0 }
 0xb89   :  { %904 = vadd.xlane.f32.xlu0 %v903_v59 }
 0xc0e   :  { %v902_v57 = vpop.xlane.xlu1 %901 }
 0xc0f   :  { %v906_v58 = vmul.f32 0.03125, %v902_v57 }
 0xc11   :  { %v908_v61 = vsub.f32 %v3126_v45, %v906_v58 }
 0xc12   :  { %v905_v17 = vpop.xlane.xlu0 %904 }
 0xc13   :  { %v907_v63 = vmul.f32 0.03125, %v905_v17  ;;  %v910_v0 = vmul.f32 %v908_v61, %v908_v61 }
 0xc15   :  { %v909_v1 = vsub.f32 %v3131_v56, %v907_v63  ;;  %v912_v4 = vsel %vm182_vm4, %v910_v0, 0.0 }
 0xc16   :  { %913 = vadd.xlane.f32.xlu0 %v912_v4 }
 0xc17   :  { %v911_v5 = vmul.f32 %v909_v1, %v909_v1 }
 0xc19   :  { %v915_v20 = vsel %vm182_vm4, %v911_v5, 0.0 }
 0xc1a   :  { %916 = vadd.xlane.f32.xlu1 %v915_v20 }
 0xc9f   :  { %v914_v8 = vpop.xlane.xlu0 %913 }
 0xca0   :  { %v918_v16 = vmul.f32 0.03125, %v914_v8 }
 0xca2   :  { %v920_v53 = vadd.f32 1e-05, %v918_v16 }
 0xca3   :  { %v917_v9 = vpop.xlane.xlu1 %916 }
 0xca4   :  { %2672 = vrsqrt.f32 %v920_v53  ;;  %v919_v10 = vmul.f32 0.03125, %v917_v9 }
 0xca6   :  { %v921_v18 = vadd.f32 1e-05, %v919_v10 }
 0xca8   :  { %2674 = vrsqrt.f32 %v921_v18 }
 0xcb1   :  { %v2673_v11 = vpop.eup %2672 }
 0xcb2   :  { %v924_v12 = vmul.f32 %v2673_v11, %v908_v61 }
 0xcb4   :  { %v932_v15 = vmul.f32 %v2206_v51, %v924_v12 }
 0xcb5   :  { %v2675_v13 = vpop.eup %2674 }
 0xcb6   :  { %v925_v14 = vmul.f32 %v2675_v13, %v909_v1  ;;  %v940_v22 = vadd.f32 %v2207_v19, %v932_v15 }
 0xcb8   :  { %v933_v21 = vmul.f32 %v2206_v51, %v925_v14 }
 0xcba   :  { %v941_v23 = vadd.f32 %v2207_v19, %v933_v21 }
 0xcbc   :  { %v942_v25 = vpack.c.bf16 %v941_v23, %v940_v22 }
 0xcbe   :  { %2464 = vmatmul.mubr.msk.bf16.vlgmr.msra.gmra.mxu0 %vm182_vm4, %v942_v25 }
 0xcbf   :  { %2491 = vmatprep.mubr.msk.bf16.mxu0 %vm2752_vm0, %v2751_v2  ;;  %2488 = vmatpush3.bf16.msra.mxu0 %v2622_v24 }
 0xcc0   :  { %2489 = vmatprep.subr.bf16.mxu0 %v2751_v2 }
 0xcc3   :  { %2490 = vmatpush3.bf16.msra.mxu0 %v2623_v27 }
 0xcc4   :  { %2495 = vmatprep.subr.bf16.mxu0 %v2751_v2 }
 0xd7e   :  { %v1003_v38 = vpop.f32.mrf.mxu0 }
 0xd7f   :  { %v1004_v39 = vadd.f32 %v2208_v37, %v1003_v38 }
 0xd80   :  { %v2465_v40 = vpop.f32.mrf.mxu0 }
 0xd81   :  { %v1010_v41 = vmul.f32 %v1004_v39, %v1004_v39 }
 0xd82   :  { %v1006_v42 = vpop.f32.mrf.mxu0 }
 0xd83   :  { %v1012_v43 = vmul.f32 %v1010_v41, %v1004_v39  ;;  %v1007_v44 = vadd.f32 %v2208_v37, %v1006_v42 }
 0xd84   :  { %v2466_v47 = vpop.f32.mrf.mxu0 }
 0xd85   :  { %v1014_v48 = vmul.f32 0.044715, %v1012_v43  ;;  %v1011_v49 = vmul.f32 %v1007_v44, %v1007_v44  ;;  %v2224_v43 = vld [vmem:[%s3444_s4 + $0x1] ss:$0 sm:$0xff]  ;;  %s3473_s4 = smov 40  }
 0xd87   :  { %v1016_v50 = vadd.f32 %v1014_v48, %v1004_v39  ;;  %v1013_v46 = vmul.f32 %v1011_v49, %v1007_v44 }
 0xd89   :  { %v1018_v52 = vmul.f32 0.7978846, %v1016_v50  ;;  %v1015_v54 = vmul.f32 0.044715, %v1013_v46  ;;  %v2230_v46 = vld [vmem:[%s3446_s6 + $0x1] ss:$0 sm:$0xff] }
 0xd8a   :  { %s3474_s6 = smov 8  }
 0xd8b   :  { %2676 = vtanh.f32 %v1018_v52  ;;  %v1017_v59 = vadd.f32 %v1015_v54, %v1007_v44 }
 0xd8d   :  { %v1019_v57 = vmul.f32 0.7978846, %v1017_v59 }
 0xd8f   :  { %2678 = vtanh.f32 %v1019_v57 }
 0xd98   :  { %v2677_v58 = vpop.eup %2676 }
 0xd99   :  { %v1022_v61 = vadd.f32 1.0, %v2677_v58 }
 0xd9b   :  { %v1024_v63 = vmul.f32 0.5, %v1022_v61 }
 0xd9c   :  { %v2679_v17 = vpop.eup %2678 }
 0xd9d   :  { %v1023_v0 = vadd.f32 1.0, %v2679_v17  ;;  %v1026_v4 = vmul.f32 %v1024_v63, %v1004_v39  ;;  %v2223_v39 = vld [vmem:[%s3443_s3 + $0x1] ss:$0 sm:$0xff]  ;;  %s3472_s3 = smov 56  }
 0xd9f   :  { %v1025_v1 = vmul.f32 0.5, %v1023_v0 }
 0xda1   :  { %v1027_v5 = vmul.f32 %v1025_v1, %v1007_v44 }
 0xda3   :  { %v1028_v20 = vpack.c.bf16 %v1027_v5, %v1026_v4 }
 0xda5   :  { %2484 = vmatmul.mubr.bf16.vlgmr.msra.gmra.mxu1 %v1028_v20 }
 0xda6   :  { %2515 = vmatprep.mubr.msk.bf16.mxu1 %vm2752_vm0, %v2751_v2 }
 0xe65   :  { %v1134_v7 = vpop.f32.mrf.mxu1 }
 0xe66   :  { %v1135_v8 = vadd.f32 %v2212_v6, %v1134_v7 }
 0xe67   :  { %v2485_v16 = vpop.f32.mrf.mxu1 }
 0xe68   :  { %v3197_v53 = vadd.f32 %v1135_v8, %v3126_v45 }
 0xe69   :  { %v1137_v9 = vpop.f32.mrf.mxu1 }
 0xe6a   :  { %v1138_v10 = vadd.f32 %v2212_v6, %v1137_v9  ;;  %v1147_v18 = vsel %vm182_vm4, %v3197_v53, 0.0 }
 0xe6b   :  { %1148 = vadd.xlane.f32.xlu0 %v1147_v18  ;;  %v2486_v11 = vpop.f32.mrf.mxu1 }
 0xe6c   :  { %v3202_v12 = vadd.f32 %v1138_v10, %v3131_v56 }
 0xe6e   :  { %v1150_v51 = vsel %vm182_vm4, %v3202_v12, 0.0 }
 0xe6f   :  { %1151 = vadd.xlane.f32.xlu1 %v1150_v51 }
 0xef4   :  { %v1149_v13 = vpop.xlane.xlu0 %1148 }
 0xef5   :  { %v1153_v14 = vmul.f32 0.03125, %v1149_v13 }
 0xef7   :  { %v1155_v15 = vsub.f32 %v3197_v53, %v1153_v14 }
 0xef8   :  { %v1152_v45 = vpop.xlane.xlu1 %1151 }
 0xef9   :  { %v1154_v19 = vmul.f32 0.03125, %v1152_v45  ;;  %v1157_v21 = vmul.f32 %v1155_v15, %v1155_v15 }
 0xefb   :  { %v1156_v22 = vsub.f32 %v3202_v12, %v1154_v19  ;;  %v1159_v23 = vsel %vm182_vm4, %v1157_v21, 0.0 }
 0xefc   :  { %1160 = vadd.xlane.f32.xlu0 %v1159_v23 }
 0xefd   :  { %v1158_v25 = vmul.f32 %v1156_v22, %v1156_v22 }
 0xeff   :  { %v1162_v56 = vsel %vm182_vm4, %v1158_v25, 0.0 }
 0xf00   :  { %1163 = vadd.xlane.f32.xlu1 %v1162_v56 }
 0xf85   :  { %v1161_v26 = vpop.xlane.xlu0 %1160 }
 0xf86   :  { %v1165_v30 = vmul.f32 0.03125, %v1161_v26 }
 0xf88   :  { %v1167_v31 = vadd.f32 1e-05, %v1165_v30 }
 0xf89   :  { %v1164_v33 = vpop.xlane.xlu1 %1163 }
 0xf8a   :  { %2680 = vrsqrt.f32 %v1167_v31  ;;  %v1166_v35 = vmul.f32 0.03125, %v1164_v33 }
 0xf8c   :  { %v1168_v36 = vadd.f32 1e-05, %v1166_v35 }
 0xf8e   :  { %2682 = vrsqrt.f32 %v1168_v36 }
 0xf97   :  { %v2681_v37 = vpop.eup %2680 }
 0xf98   :  { %v1171_v38 = vmul.f32 %v2681_v37, %v1155_v15 }
 0xf9a   :  { %v1179_v42 = vmul.f32 %v2223_v39, %v1171_v38 }
 0xf9b   :  { %v2683_v40 = vpop.eup %2682 }
 0xf9c   :  { %v1172_v41 = vmul.f32 %v2683_v40, %v1156_v22  ;;  %v1187_v47 = vadd.f32 %v2224_v43, %v1179_v42 }
 0xf9e   :  { %v1180_v44 = vmul.f32 %v2223_v39, %v1172_v41 }
 0xfa0   :  { %v1188_v48 = vadd.f32 %v2224_v43, %v1180_v44 }
 0xfa2   :  { %v1189_v49 = vpack.c.bf16 %v1188_v48, %v1187_v47 }
 0xfa4   :  { %2492 = vmatmul.mubr.msk.bf16.vlgmr.msra.gmra.mxu0 %vm182_vm4, %v1189_v49 }
 0xfa5   :  { %2497 = vmatprep.mubr.msk.bf16.mxu0 %vm2752_vm0, %v2751_v2 }
0x1064   :  { %v1252_v50 = vpop.f32.mrf.mxu0 }
0x1065   :  { %v1253_v59 = vadd.f32 %v2230_v46, %v1252_v50 }
0x1066   :  { %v2493_v52 = vpop.f32.mrf.mxu0 }
0x1068   :  { %v1255_v54 = vpop.f32.mrf.mxu0 }
0x1069   :  { %v1256_v57 = vadd.f32 %v2230_v46, %v1255_v54 }
0x106a   :  { %v2494_v58 = vpop.f32.mrf.mxu0 }
0x106b   :  { %v3230_v61 = vpack.c.bf16 %v1256_v57, %v1253_v59 }
0x106d   :  { %1263 = vrot.lane.b32.xlu0 %v3230_v61, %s2754_s26  ;;  %s3475_s26 = smov 16  }
0x1071   :  { %1388 = vrot.lane.b32.xlu0 %v3230_v61, %s2757_s19 }
0x1075   :  { %1386 = vrot.lane.b32.xlu0 %v3230_v61, %s2755_s29 }
0x1079   :  { %1519 = vrot.lane.b32.xlu0 %v3230_v61, %s2760_s25  ;;  %s3476_s25 = smov 24  }
0x107d   :  { %1652 = vrot.lane.b32.xlu0 %v3230_v61, %s2763_s21 }
0x10df   :  { %v1264_v17 = vpop.permute.xlu0 %1263 }
0x10e0   :  { %v1269_v63 = vsel %vm300_vm5, %v1264_v17, 0 }
0x10e1   :  { %2496 = vmatpush3.bf16.xpose.msra.mxu0 %v1269_v63 }
0x10e2   :  { %2501 = vmatprep.subr.bf16.mxu0 %v2751_v2 }
0x10e3   :  { %v1389_v14 = vpop.permute.xlu0 %1388 }
0x10e4   :  { %v1394_v45 = vsel %vm300_vm5, %v1389_v14, 0 }
0x10e7   :  { %v1387_v21 = vpop.permute.xlu0 %1386 }
0x10e8   :  { %2498 = vmatmul.mubr.msk.bf16.vlgmr.msra.gmra.mxu0 %vm300_vm5, %v3230_v61 }
0x10e9   :  { %2503 = vmatprep.mubr.msk.bf16.mxu0 %vm2752_vm0, %v2751_v2 }
0x10eb   :  { %v1520_v25 = vpop.permute.xlu0 %1519 }
0x10ef   :  { %v1653_v24 = vpop.permute.xlu0 %1652 }
0x11a8   :  { %v1305_v0 = vpop.f32.mrf.mxu0 }
0x11a9   :  { %v1306_v1 = vadd.f32 %v1305_v0, %v2951_v62 }
0x11aa   :  { %v2499_v4 = vpop.f32.mrf.mxu0 }
0x11ab   :  { %v1312_v5 = vsel %vm348_vm6, %v1306_v1, -inf }
0x11ac   :  { %1313 = vmax.xlane.f32.xlu1 %v1312_v5  ;;  %v1308_v20 = vpop.f32.mrf.mxu0 }
0x11ad   :  { %v1309_v6 = vadd.f32 %v1308_v20, %v2957_v3 }
0x11ae   :  { %v2500_v7 = vpop.f32.mrf.mxu0 }
0x11af   :  { %v1315_v8 = vsel %vm348_vm6, %v1309_v6, -inf }
0x11b0   :  { %1316 = vmax.xlane.f32.xlu1 %v1315_v8 }
0x11c1   :  { %1331 = vrot.lane.b32.xlu1 %v3230_v61, %s2756_s18 }
0x11c5   :  { %1521 = vrot.lane.b32.xlu1 %v3230_v61, %s2758_s23 }
0x11c9   :  { %1654 = vrot.lane.b32.xlu1 %v3230_v61, %s2761_s1 }
0x1235   :  { %v1314_v62 = vpop.xlane.xlu1 %1313 }
0x1236   :  { %v1318_v16 = vsub.f32 %v1306_v1, %v1314_v62 }
0x1238   :  { %v1320_v9 = vmul.f32 1.442695, %v1318_v16 }
0x1239   :  { %v1317_v10 = vpop.xlane.xlu1 %1316 }
0x123a   :  { %v1319_v18 = vsub.f32 %v1309_v6, %v1317_v10  ;;  %2684 = vpow2.f32 %v1320_v9 }
0x123c   :  { %v1322_v11 = vmul.f32 1.442695, %v1319_v18 }
0x123d   :  { %v1332_v3 = vpop.permute.xlu1 %1331 }
0x123e   :  { %2686 = vpow2.f32 %v1322_v11  ;;  %2502 = vmatpush3.bf16.msra.mxu0 %v1332_v3 }
0x123f   :  { %2507 = vmatprep.subr.bf16.mxu0 %v2751_v2 }
0x1241   :  { %v1522_v19 = vpop.permute.xlu1 %1521 }
0x1242   :  { %v1527_v22 = vsel %vm300_vm5, %v1522_v19, 0 }
0x1245   :  { %v1655_v23 = vpop.permute.xlu1 %1654 }
0x1246   :  { %v1660_v56 = vsel %vm300_vm5, %v1655_v23, 0 }
0x1247   :  { %v3259_v51 = vpop.eup %2684 }
0x124b   :  { %v3261_v13 = vpop.eup %2686 }
0x124c   :  { %v1330_v15 = vpack.c.bf16 %v3261_v13, %v3259_v51 }
0x124e   :  { %2504 = vmatmul.mubr.msk.bf16.vlgmr.msra.gmra.mxu0 %vm348_vm6, %v1330_v15 }
0x124f   :  { %2508 = vmatpush3.bf16.xpose.msra.mxu0 %v1394_v45  ;;  %2509 = vmatprep.mubr.msk.bf16.mxu0 %vm2752_vm0, %v2751_v2 }
0x1250   :  { %2519 = vmatprep.subr.bf16.mxu0 %v2751_v2 }
0x1256   :  { %2510 = vmatmul.mubr.msk.bf16.vlgmr.msra.gmra.mxu0 %vm300_vm5, %v1387_v21 }
0x1257   :  { %2520 = vmatpush3.bf16.xpose.msra.mxu0 %v1527_v22  ;;  %2521 = vmatprep.mubr.msk.bf16.mxu0 %vm2752_vm0, %v2751_v2 }
0x1258   :  { %2531 = vmatprep.subr.bf16.mxu0 %v2751_v2 }
0x125e   :  { %2522 = vmatmul.mubr.msk.bf16.vlgmr.msra.gmra.mxu0 %vm300_vm5, %v1520_v25 }
0x125f   :  { %2532 = vmatpush3.bf16.xpose.msra.mxu0 %v1660_v56  ;;  %2533 = vmatprep.mubr.msk.bf16.mxu0 %vm2752_vm0, %v2751_v2  ;;  %v1324_v56 = vsel %vm348_vm6, %v3259_v51, 0.0  ;;  %v1327_v51 = vsel %vm348_vm6, %v3261_v13, 0.0 }
0x1260   :  { %2543 = vmatprep.subr.bf16.mxu0 %v2751_v2 }
0x1266   :  { %2534 = vmatmul.mubr.msk.bf16.vlgmr.msra.gmra.mxu0 %vm300_vm5, %v1653_v24 }
0x1267   :  { %2547 = vmatprep.mubr.msk.bf16.mxu0 %vm2752_vm0, %v2751_v2 }
0x130e   :  { %v3283_v27 = vpop.f32.mrf.mxu0 }
0x1310   :  { %v2505_v26 = vpop.f32.mrf.mxu0 }
0x1312   :  { %v3285_v30 = vpop.f32.mrf.mxu0 }
0x1314   :  { %v2506_v31 = vpop.f32.mrf.mxu0 }
0x1316   :  { %v1430_v33 = vpop.f32.mrf.mxu0 }
0x1317   :  { %v1431_v35 = vadd.f32 %v2990_v28, %v1430_v33 }
0x1318   :  { %v2511_v36 = vpop.f32.mrf.mxu0 }
0x1319   :  { %v1437_v37 = vsel %vm348_vm6, %v1431_v35, -inf }
0x131a   :  { %1438 = vmax.xlane.f32.xlu1 %v1437_v37  ;;  %v1433_v38 = vpop.f32.mrf.mxu0 }
0x131b   :  { %v1434_v39 = vadd.f32 %v2996_v32, %v1433_v38 }
0x131c   :  { %v2512_v40 = vpop.f32.mrf.mxu0 }
0x131d   :  { %v1440_v41 = vsel %vm348_vm6, %v1434_v39, -inf }
0x131e   :  { %1441 = vmax.xlane.f32.xlu0 %v1440_v41  ;;  %v1563_v42 = vpop.f32.mrf.mxu0 }
0x131f   :  { %v1564_v43 = vadd.f32 %v3029_v55, %v1563_v42 }
0x1320   :  { %v2523_v44 = vpop.f32.mrf.mxu0 }
0x1321   :  { %v1570_v47 = vsel %vm348_vm6, %v1564_v43, -inf }
0x1322   :  { %1571 = vmax.xlane.f32.xlu0 %v1570_v47  ;;  %v1566_v48 = vpop.f32.mrf.mxu0 }
0x1323   :  { %v1567_v28 = vadd.f32 %v3035_v60, %v1566_v48 }
0x1324   :  { %v2524_v49 = vpop.f32.mrf.mxu0 }
0x1325   :  { %v1573_v50 = vsel %vm348_vm6, %v1567_v28, -inf }
0x1326   :  { %1574 = vmax.xlane.f32.xlu1 %v1573_v50  ;;  %v1696_v46 = vpop.f32.mrf.mxu0 }
0x1327   :  { %v1697_v32 = vadd.f32 %v3062_v29, %v1696_v46 }
0x1328   :  { %v2535_v52 = vpop.f32.mrf.mxu0 }
0x1329   :  { %v1703_v54 = vsel %vm348_vm6, %v1697_v32, -inf }
0x132a   :  { %1704 = vmax.xlane.f32.xlu0 %v1703_v54  ;;  %v1699_v59 = vpop.f32.mrf.mxu0 }
0x132b   :  { %v1700_v60 = vadd.f32 %v3068_v34, %v1699_v59 }
0x132c   :  { %v2536_v55 = vpop.f32.mrf.mxu0 }
0x132d   :  { %v1706_v57 = vsel %vm348_vm6, %v1700_v60, -inf }
0x1337   :  { %1589 = vrot.lane.b32.xlu1 %v3230_v61, %s2762_s20 }
0x1340   :  { %1456 = vrot.lane.b32.xlu0 %v3230_v61, %s3472_s3 }
0x135b   :  { %1707 = vmax.xlane.f32.xlu1 %v1706_v57 }
0x136c   :  { %1722 = vrot.lane.b32.xlu1 %v3230_v61, %s3473_s4 }
0x13a3   :  { %v1439_v29 = vpop.xlane.xlu1 %1438 }
0x13a4   :  { %v1443_v58 = vsub.f32 %v1431_v35, %v1439_v29 }
0x13a6   :  { %v1445_v17 = vmul.f32 1.442695, %v1443_v58 }
0x13a7   :  { %v1442_v63 = vpop.xlane.xlu0 %1441 }
0x13a8   :  { %2688 = vpow2.f32 %v1445_v17  ;;  %v1444_v0 = vsub.f32 %v1434_v39, %v1442_v63 }
0x13aa   :  { %v1447_v1 = vmul.f32 1.442695, %v1444_v0 }
0x13ab   :  { %v1572_v4 = vpop.xlane.xlu0 %1571 }
0x13ac   :  { %2690 = vpow2.f32 %v1447_v1  ;;  %v1576_v5 = vsub.f32 %v1564_v43, %v1572_v4  ;;  %v2624_v4 = vld [vmem:[%s3447_s7 + $0x18] sm:$0xff]  }
0x13ad   :  { %2544 = vmatpush3.bf16.msra.mxu0 %v2624_v4  ;;  %v2632_v4 = vld [vmem:[%s3453_s13 + $0x58] sm:$0xff]  }
0x13ae   :  { %v1578_v20 = vmul.f32 1.442695, %v1576_v5  ;;  %v2625_v5 = vld [vmem:[%s3447_s7 + $0x10] sm:$0xff]   ;;  %2545 = vmatprep.subr.bf16.mxu0 %v2751_v2 }
0x13af   :  { %v1575_v6 = vpop.xlane.xlu1 %1574 }
0x13b0   :  { %2692 = vpow2.f32 %v1578_v20  ;;  %v1577_v34 = vsub.f32 %v1567_v28, %v1575_v6 }
0x13b1   :  { %2546 = vmatpush3.bf16.msra.mxu0 %v2625_v5  ;;  %v2633_v5 = vld [vmem:[%s3453_s13 + $0x50] sm:$0xff]  }
0x13b2   :  { %v1580_v7 = vmul.f32 1.442695, %v1577_v34  ;;  %2559 = vmatprep.subr.bf16.mxu0 %v2751_v2 }
0x13b3   :  { %v1705_v8 = vpop.xlane.xlu0 %1704  ;;  %v1590_v14 = vpop.permute.xlu1 %1589 }
0x13b4   :  { %2694 = vpow2.f32 %v1580_v7  ;;  %v1709_v62 = vsub.f32 %v1697_v32, %v1705_v8 }
0x13b5   :  { %v2689_v16 = vpop.eup %2688 }
0x13b6   :  { %v1711_v61 = vmul.f32 1.442695, %v1709_v62  ;;  %v1449_v9 = vsel %vm348_vm6, %v2689_v16, 0.0 }
0x13b7   :  { %1450 = vadd.xlane.f32.xlu0 %v1449_v9  ;;  %v1457_v10 = vpop.permute.xlu0 %1456 }
0x13b8   :  { %2696 = vpow2.f32 %v1711_v61  ;;  %2514 = vmatpush3.bf16.msra.mxu1 %v1457_v10 }
0x13b9   :  { %v2691_v18 = vpop.eup %2690  ;;  %2525 = vmatprep.subr.bf16.mxu1 %v2751_v2 }
0x13ba   :  { %v1452_v11 = vsel %vm348_vm6, %v2691_v18, 0.0  ;;  %v1455_v3 = vpack.c.bf16 %v2691_v18, %v2689_v16 }
0x13bb   :  { %1453 = vadd.xlane.f32.xlu1 %v1452_v11 }
0x13bc   :  { %2516 = vmatmul.mubr.msk.bf16.vlgmr.msra.gmra.mxu1 %vm348_vm6, %v1455_v3 }
0x13bd   :  { %v2693_v15 = vpop.eup %2692  ;;  %2526 = vmatpush3.bf16.msra.mxu1 %v1590_v14  ;;  %2527 = vmatprep.mubr.msk.bf16.mxu1 %vm2752_vm0, %v2751_v2 }
0x13be   :  { %v1582_v45 = vsel %vm348_vm6, %v2693_v15, 0.0  ;;  %2537 = vmatprep.subr.bf16.mxu1 %v2751_v2 }
0x13bf   :  { %1583 = vadd.xlane.f32.xlu0 %v1582_v45 }
0x13c1   :  { %v2695_v19 = vpop.eup %2694 }
0x13c2   :  { %v1585_v21 = vsel %vm348_vm6, %v2695_v19, 0.0  ;;  %v1588_v22 = vpack.c.bf16 %v2695_v19, %v2693_v15  ;;  %v2253_v19 = vld [vmem:[%s3448_s8 + $0x1] ss:$0 sm:$0xff] }
0x13c3   :  { %1586 = vadd.xlane.f32.xlu0 %v1585_v21 }
0x13c4   :  { %2528 = vmatmul.mubr.msk.bf16.vlgmr.msra.gmra.mxu1 %vm348_vm6, %v1588_v22 }
0x13c5   :  { %v2697_v23 = vpop.eup %2696  ;;  %2539 = vmatprep.mubr.msk.bf16.mxu1 %vm2752_vm0, %v2751_v2 }
0x13c6   :  { %v1715_v25 = vsel %vm348_vm6, %v2697_v23, 0.0 }
0x13c7   :  { %1716 = vadd.xlane.f32.xlu1 %v1715_v25 }
0x13cb   :  { %1325 = vadd.xlane.f32.xlu1 %v1324_v56 }
0x13e4   :  { %v1708_v24 = vpop.xlane.xlu1 %1707 }
0x13e5   :  { %v1710_v26 = vsub.f32 %v1700_v60, %v1708_v24 }
0x13e7   :  { %v1713_v31 = vmul.f32 1.442695, %v1710_v26 }
0x13e8   :  { %v1723_v33 = vpop.permute.xlu1 %1722 }
0x13e9   :  { %2698 = vpow2.f32 %v1713_v31  ;;  %2538 = vmatpush3.bf16.msra.mxu1 %v1723_v33 }
0x13ea   :  { %2551 = vmatprep.subr.bf16.mxu1 %v2751_v2 }
0x13f6   :  { %v2699_v35 = vpop.eup %2698 }
0x13f7   :  { %v1718_v36 = vsel %vm348_vm6, %v2699_v35, 0.0  ;;  %v1721_v37 = vpack.c.bf16 %v2699_v35, %v2697_v23 }
0x13f8   :  { %1719 = vadd.xlane.f32.xlu0 %v1718_v36 }
0x13f9   :  { %2540 = vmatmul.mubr.msk.bf16.vlgmr.msra.gmra.mxu1 %vm348_vm6, %v1721_v37 }
0x13fa   :  { %2555 = vmatprep.mubr.msk.bf16.mxu1 %vm2752_vm0, %v2751_v2 }
0x13fc   :  { %1328 = vadd.xlane.f32.xlu0 %v1327_v51 }
0x1440   :  { %v1451_v43 = vpop.xlane.xlu0 %1450 }
0x1444   :  { %v1454_v38 = vpop.xlane.xlu1 %1453 }
0x1448   :  { %v1584_v44 = vpop.xlane.xlu0 %1583 }
0x144c   :  { %v1587_v47 = vpop.xlane.xlu0 %1586 }
0x1450   :  { %v1717_v39 = vpop.xlane.xlu1 %1716 }
0x1454   :  { %v1326_v40 = vpop.xlane.xlu1 %1325 }
0x1455   :  { %2700 = vrcp.f32 %v1326_v40 }
0x1456   :  { %2702 = vrcp.f32 %v1451_v43  ;;  %v2626_v43 = vld [vmem:[%s3451_s11 + $0x18] sm:$0xff]  }
0x1457   :  { %2704 = vrcp.f32 %v1454_v38  ;;  %2552 = vmatpush3.bf16.msra.mxu1 %v2626_v43 }
0x1458   :  { %2706 = vrcp.f32 %v1584_v44  ;;  %v2627_v44 = vld [vmem:[%s3451_s11 + $0x10] sm:$0xff]   ;;  %2553 = vmatprep.subr.bf16.mxu1 %v2751_v2  ;;  %s2159_s11 = sshll.u32 %s2768_s0, 4  ;;  %s2160_s11 = int_to_ptr.vmem [resolvable:$true] %s2159_s11 }
0x1459   :  { %2708 = vrcp.f32 %v1587_v47  ;;  %s2728_s22 = scalar_lea.vmem %s2160_s11, 256  ;;  %p2733_p1 = scmp.lt.s32.totalorder %s2160_s11, %s2160_s11 }
0x145a   :  { %p2729_p0 = scmp.ne.s32.totalorder %s2160_s11, %s2728_s22  ;;  %p2734_p2 = scmp.lt.s32.totalorder %s2728_s22, %s2728_s22 }
0x145b   :  { %2554 = vmatpush3.bf16.msra.mxu1 %v2627_v44 }
0x145c   :  { %p2735_p3 = por %p2734_p2, %p2733_p1 }
0x145e   :  { %p2736_p4 = pnand %p2735_p3, %p2729_p0 }
0x1462   :  { %v2701_v41 = vpop.eup %2700 }
0x1463   :  { %v1380_v42 = vmul.f32 %v2701_v41, %v3283_v27  ;;  %v2703_v48 = vpop.eup %2702 }
0x1464   :  { %v2705_v50 = vpop.eup %2704 }
0x1465   :  { %1382 = vst.msk [vmem:[#allocation2] sm:$0xff] %vm300_vm5, %v1380_v42  ;;  %v2707_v54 = vpop.eup %2706 }
0x1466   :  { %v2709_v29 = vpop.eup %2708 }
0x147c   :  { %v1496_v28 = vpop.f32.mrf.mxu1 }
0x147d   :  { %v1505_v13 = vmul.f32 %v2703_v48, %v1496_v28 }
0x147e   :  { %v2517_v49 = vpop.f32.mrf.mxu1 }
0x147f   :  { %1509 = vrot.lane.b32.xlu1 %v1505_v13, %s3474_s6 }
0x1480   :  { %v1499_v46 = vpop.f32.mrf.mxu1 }
0x1481   :  { %v1506_v32 = vmul.f32 %v2705_v50, %v1499_v46  ;;  %v1720_v52 = vpop.xlane.xlu0 %1719 }
0x1482   :  { %v2518_v27 = vpop.f32.mrf.mxu1 }
0x1483   :  { %1511 = vrot.lane.b32.xlu0 %v1506_v32, %s3474_s6 }
0x1484   :  { %v1629_v59 = vpop.f32.mrf.mxu1 }
0x1485   :  { %v1638_v55 = vmul.f32 %v2707_v54, %v1629_v59  ;;  %v1329_v60 = vpop.xlane.xlu0 %1328 }
0x1486   :  { %2710 = vrcp.f32 %v1329_v60  ;;  %v2529_v57 = vpop.f32.mrf.mxu1 }
0x1487   :  { %1642 = vrot.lane.b32.xlu1 %v1638_v55, %s3475_s26  ;;  %2712 = vrcp.f32 %v1717_v39  ;;  %v2260_v55 = vld [vmem:[%s3450_s10 + $0x1] ss:$0 sm:$0xff] }
0x1488   :  { %v1632_v58 = vpop.f32.mrf.mxu1  ;;  %2714 = vrcp.f32 %v1720_v52  ;;  %v2259_v52 = vld [vmem:[%s3449_s9 + $0x1] ss:$0 sm:$0xff] }
0x1489   :  { %v1639_v17 = vmul.f32 %v2709_v29, %v1632_v58 }
0x148a   :  { %v2530_v63 = vpop.f32.mrf.mxu1 }
0x148b   :  { %1644 = vrot.lane.b32.xlu1 %v1639_v17, %s3475_s26  ;;  %v2628_v17 = vld [vmem:[%s3453_s13 + $0x78] sm:$0xff]   ;;  %v2629_v63 = vld [vmem:[%s3453_s13 + $0x70] sm:$0xff]  }
0x1493   :  { %v2711_v0 = vpop.eup %2710 }
0x1494   :  { %v1381_v1 = vmul.f32 %v2711_v0, %v3285_v30  ;;  %v2713_v20 = vpop.eup %2712  ;;  %v2630_v0 = vld [vmem:[%s3453_s13 + $0x68] sm:$0xff]  }
0x1495   :  { %v2715_v7 = vpop.eup %2714 }
0x1496   :  { %1383 = vst.msk [vmem:[#allocation2 + $0x8] sm:$0xff] %vm300_vm5, %v1381_v1  ;;  %v2631_v1 = vld [vmem:[%s3453_s13 + $0x60] sm:$0xff]  }
0x14b9   :  { %v1762_v6 = vpop.f32.mrf.mxu1 }
0x14ba   :  { %v1771_v34 = vmul.f32 %v2713_v20, %v1762_v6  ;;  %v2634_v20 = vld [vmem:[%s3453_s13 + $0x48] sm:$0xff]   ;;  %v2635_v6 = vld [vmem:[%s3453_s13 + $0x40] sm:$0xff]  }
0x14bb   :  { %v2541_v30 = vpop.f32.mrf.mxu1 }
0x14bc   :  { %1775 = vrot.lane.b32.xlu0 %v1771_v34, %s3476_s25  ;;  %v2266_v34 = vld [vmem:[%s3452_s12 + $0x1] ss:$0 sm:$0xff] }
0x14bd   :  { %v1765_v8 = vpop.f32.mrf.mxu1 }
0x14be   :  { %v1772_v62 = vmul.f32 %v2715_v7, %v1765_v8 }
0x14bf   :  { %v2542_v16 = vpop.f32.mrf.mxu1 }
0x14c0   :  { %1777 = vrot.lane.b32.xlu1 %v1772_v62, %s3476_s25 }
0x14f1   :  { %v1510_v61 = vpop.permute.xlu1 %1509 }
0x14f2   :  { %1515 = vst.msk [vmem:[#allocation2] sm:$0xff] %vm553_vm7, %v1510_v61 }
0x14f5   :  { %v1512_v9 = vpop.permute.xlu0 %1511 }
0x14f6   :  { %1516 = vst.msk [vmem:[#allocation2 + $0x8] sm:$0xff] %vm553_vm7, %v1512_v9 }
0x14f9   :  { %v1643_v10 = vpop.permute.xlu1 %1642 }
0x14fa   :  { %1648 = vst.msk [vmem:[#allocation2] sm:$0xff] %vm688_vm8, %v1643_v10 }
0x14fd   :  { %v1645_v18 = vpop.permute.xlu1 %1644 }
0x14fe   :  { %1649 = vst.msk [vmem:[#allocation2 + $0x8] sm:$0xff] %vm688_vm8, %v1645_v18 }
0x152e   :  { %v1776_v11 = vpop.permute.xlu0 %1775 }
0x152f   :  { %1781 = vst.msk [vmem:[#allocation2] sm:$0xff] %vm823_vm9, %v1776_v11 }
0x1532   :  { %v1778_v3 = vpop.permute.xlu1 %1777 }
0x1533   :  { %1782 = vst.msk [vmem:[#allocation2 + $0x8] sm:$0xff] %vm823_vm9, %v1778_v3 }
0x1536   :  { %v1783_v14 = vld [vmem:[#allocation2] sm:$0xff] }
0x153a   :  { %v1784_v15 = vld [vmem:[#allocation2 + $0x8] sm:$0xff] }
0x153b   :  { %v1785_v45 = vpack.c.bf16 %v1784_v15, %v1783_v14 }
0x153d   :  { %2548 = vmatmul.mubr.msk.bf16.vlgmr.msra.gmra.mxu0 %vm182_vm4, %v1785_v45 }
0x153e   :  { %2575 = vmatprep.mubr.msk.bf16.mxu0 %vm2752_vm0, %v2751_v2  ;;  %2560 = vmatpush3.bf16.msra.mxu0 %v2628_v17  ;;  %v2297_v17 = vld [vmem:[%s3456_s16] ss:$0 sm:$0xff] }
0x153f   :  { %2561 = vmatprep.subr.bf16.mxu0 %v2751_v2 }
0x1542   :  { %2562 = vmatpush3.bf16.msra.mxu0 %v2629_v63 }
0x1543   :  { %2563 = vmatprep.subr.bf16.mxu0 %v2751_v2 }
0x1546   :  { %2564 = vmatpush3.bf16.msra.mxu0 %v2630_v0 }
0x1547   :  { %2565 = vmatprep.subr.bf16.mxu0 %v2751_v2 }
0x154a   :  { %2566 = vmatpush3.bf16.msra.mxu0 %v2631_v1 }
0x154b   :  { %2567 = vmatprep.subr.bf16.mxu0 %v2751_v2 }
0x154e   :  { %2568 = vmatpush3.bf16.msra.mxu0 %v2632_v4 }
0x154f   :  { %2569 = vmatprep.subr.bf16.mxu0 %v2751_v2 }
0x1552   :  { %2570 = vmatpush3.bf16.msra.mxu0 %v2633_v5 }
0x1553   :  { %2571 = vmatprep.subr.bf16.mxu0 %v2751_v2 }
0x1556   :  { %2572 = vmatpush3.bf16.msra.mxu0 %v2634_v20 }
0x1557   :  { %2573 = vmatprep.subr.bf16.mxu0 %v2751_v2 }
0x155a   :  { %2574 = vmatpush3.bf16.msra.mxu0 %v2635_v6 }
0x15fd   :  { %v1848_v21 = vpop.f32.mrf.mxu0 }
0x15fe   :  { %v1849_v22 = vadd.f32 %v2253_v19, %v1848_v21 }
0x15ff   :  { %v2549_v23 = vpop.f32.mrf.mxu0 }
0x1600   :  { %v3358_v25 = vadd.f32 %v1849_v22, %v3197_v53 }
0x1601   :  { %v1851_v56 = vpop.f32.mrf.mxu0 }
0x1602   :  { %v1852_v24 = vadd.f32 %v2253_v19, %v1851_v56  ;;  %v1861_v26 = vsel %vm182_vm4, %v3358_v25, 0.0 }
0x1603   :  { %1862 = vadd.xlane.f32.xlu0 %v1861_v26  ;;  %v2550_v31 = vpop.f32.mrf.mxu0 }
0x1604   :  { %v3363_v33 = vadd.f32 %v1852_v24, %v3202_v12 }
0x1606   :  { %v1864_v35 = vsel %vm182_vm4, %v3363_v33, 0.0 }
0x1607   :  { %1865 = vadd.xlane.f32.xlu1 %v1864_v35 }
0x168c   :  { %v1863_v36 = vpop.xlane.xlu0 %1862 }
0x168d   :  { %v1867_v37 = vmul.f32 0.03125, %v1863_v36 }
0x168f   :  { %v1869_v51 = vsub.f32 %v3358_v25, %v1867_v37  ;;  %v2287_v37 = vld [vmem:[%s3454_s14 + $0x1] ss:$0 sm:$0xff] }
0x1690   :  { %v1866_v53 = vpop.xlane.xlu1 %1865 }
0x1691   :  { %v1868_v38 = vmul.f32 0.03125, %v1866_v53  ;;  %v1871_v39 = vmul.f32 %v1869_v51, %v1869_v51 }
0x1693   :  { %v1870_v40 = vsub.f32 %v3363_v33, %v1868_v38  ;;  %v1873_v41 = vsel %vm182_vm4, %v1871_v39, 0.0 }
0x1694   :  { %1874 = vadd.xlane.f32.xlu0 %v1873_v41 }
0x1695   :  { %v1872_v42 = vmul.f32 %v1870_v40, %v1870_v40 }
0x1697   :  { %v1876_v12 = vsel %vm182_vm4, %v1872_v42, 0.0 }
0x1698   :  { %1877 = vadd.xlane.f32.xlu0 %v1876_v12 }
0x171d   :  { %v1875_v47 = vpop.xlane.xlu0 %1874 }
0x171e   :  { %v1879_v48 = vmul.f32 0.03125, %v1875_v47 }
0x1720   :  { %v1881_v28 = vadd.f32 1e-05, %v1879_v48 }
0x1721   :  { %v1878_v13 = vpop.xlane.xlu0 %1877 }
0x1722   :  { %2716 = vrsqrt.f32 %v1881_v28  ;;  %v1880_v49 = vmul.f32 0.03125, %v1878_v13 }
0x1724   :  { %v1882_v50 = vadd.f32 1e-05, %v1880_v49 }
0x1726   :  { %2718 = vrsqrt.f32 %v1882_v50 }
0x172f   :  { %v2717_v46 = vpop.eup %2716 }
0x1730   :  { %v1885_v32 = vmul.f32 %v2717_v46, %v1869_v51 }
0x1732   :  { %v1893_v59 = vmul.f32 %v2259_v52, %v1885_v32 }
0x1733   :  { %v2719_v27 = vpop.eup %2718 }
0x1734   :  { %v1886_v54 = vmul.f32 %v2719_v27, %v1870_v40  ;;  %v1901_v57 = vadd.f32 %v2260_v55, %v1893_v59 }
0x1736   :  { %v1894_v60 = vmul.f32 %v2259_v52, %v1886_v54 }
0x1738   :  { %v1902_v29 = vadd.f32 %v2260_v55, %v1894_v60 }
0x173a   :  { %v1903_v58 = vpack.c.bf16 %v1902_v29, %v1901_v57  ;;  %v2296_v29 = vld [vmem:[%s3455_s15] ss:$0 sm:$0xff] }
0x173c   :  { %2556 = vmatmul.mubr.msk.bf16.vlgmr.msra.gmra.mxu1 %vm182_vm4, %v1903_v58 }
0x17fc   :  { %v1966_v30 = vpop.f32.mrf.mxu1 }
0x17fd   :  { %v1967_v7 = vadd.f32 %v2266_v34, %v1966_v30 }
0x17fe   :  { %v2557_v8 = vpop.f32.mrf.mxu1 }
0x17ff   :  { %v1973_v62 = vmul.f32 %v1967_v7, %v1967_v7 }
0x1800   :  { %v1969_v16 = vpop.f32.mrf.mxu1 }
0x1801   :  { %v1975_v61 = vmul.f32 %v1973_v62, %v1967_v7  ;;  %v1970_v9 = vadd.f32 %v2266_v34, %v1969_v16 }
0x1802   :  { %v2558_v10 = vpop.f32.mrf.mxu1 }
0x1803   :  { %v1977_v18 = vmul.f32 0.044715, %v1975_v61  ;;  %v1974_v11 = vmul.f32 %v1970_v9, %v1970_v9 }
0x1805   :  { %v1979_v2 = vadd.f32 %v1977_v18, %v1967_v7  ;;  %v1976_v3 = vmul.f32 %v1974_v11, %v1970_v9 }
0x1807   :  { %v1981_v14 = vmul.f32 0.7978846, %v1979_v2  ;;  %v1978_v15 = vmul.f32 0.044715, %v1976_v3 }
0x1809   :  { %2720 = vtanh.f32 %v1981_v14  ;;  %v1980_v45 = vadd.f32 %v1978_v15, %v1970_v9 }
0x180b   :  { %v1982_v19 = vmul.f32 0.7978846, %v1980_v45 }
0x180d   :  { %2722 = vtanh.f32 %v1982_v19 }
0x1816   :  { %v2721_v21 = vpop.eup %2720 }
0x1817   :  { %v1985_v22 = vadd.f32 1.0, %v2721_v21 }
0x1819   :  { %v1987_v56 = vmul.f32 0.5, %v1985_v22 }
0x181a   :  { %v2723_v23 = vpop.eup %2722 }
0x181b   :  { %v1986_v24 = vadd.f32 1.0, %v2723_v23  ;;  %v1989_v31 = vmul.f32 %v1987_v56, %v1967_v7 }
0x181d   :  { %v1988_v26 = vmul.f32 0.5, %v1986_v24 }
0x181f   :  { %v1990_v35 = vmul.f32 %v1988_v26, %v1970_v9 }
0x1821   :  { %v1991_v36 = vpack.c.bf16 %v1990_v35, %v1989_v31 }
0x1823   :  { %2576 = vmatmul.mubr.bf16.vlgmr.msra.gmra.mxu0 %v1991_v36 }
0x18e3   :  { %v2099_v51 = vpop.f32.mrf.mxu0 }
0x18e4   :  { %v2100_v53 = vadd.f32 %v2287_v37, %v2099_v51 }
0x18e5   :  { %v2577_v38 = vpop.f32.mrf.mxu0 }
0x18e6   :  { %v2106_v39 = vadd.f32 %v2100_v53, %v3358_v25 }
0x18e7   :  { %v2102_v40 = vpop.f32.mrf.mxu0 }
0x18e8   :  { %v2103_v41 = vadd.f32 %v2287_v37, %v2102_v40  ;;  %v2110_v42 = vsel %vm182_vm4, %v2106_v39, 0.0 }
0x18e9   :  { %2111 = vadd.xlane.f32.xlu1 %v2110_v42  ;;  %v2578_v12 = vpop.f32.mrf.mxu0 }
0x18ea   :  { %v2107_v43 = vadd.f32 %v2103_v41, %v3363_v33 }
0x18ec   :  { %v2113_v44 = vsel %vm182_vm4, %v2107_v43, 0.0 }
0x18ed   :  { %2114 = vadd.xlane.f32.xlu0 %v2113_v44 }
0x1972   :  { %v2112_v47 = vpop.xlane.xlu1 %2111 }
0x1973   :  { %v2116_v48 = vmul.f32 0.03125, %v2112_v47 }
0x1975   :  { %v2118_v28 = vsub.f32 %v2106_v39, %v2116_v48 }
0x1976   :  { %v2115_v13 = vpop.xlane.xlu0 %2114 }
0x1977   :  { %v2117_v49 = vmul.f32 0.03125, %v2115_v13  ;;  %v2120_v50 = vmul.f32 %v2118_v28, %v2118_v28 }
0x1979   :  { %v2119_v46 = vsub.f32 %v2107_v43, %v2117_v49  ;;  %v2122_v25 = vsel %vm182_vm4, %v2120_v50, 0.0 }
0x197a   :  { %2123 = vadd.xlane.f32.xlu1 %v2122_v25 }
0x197b   :  { %v2121_v32 = vmul.f32 %v2119_v46, %v2119_v46 }
0x197d   :  { %v2125_v52 = vsel %vm182_vm4, %v2121_v32, 0.0 }
0x197e   :  { %2126 = vadd.xlane.f32.xlu0 %v2125_v52 }
0x1a03   :  { %v2124_v27 = vpop.xlane.xlu1 %2123 }
0x1a04   :  { %v2128_v54 = vmul.f32 0.03125, %v2124_v27 }
0x1a06   :  { %v2130_v33 = vadd.f32 1e-05, %v2128_v54 }
0x1a07   :  { %v2127_v59 = vpop.xlane.xlu0 %2126 }
0x1a08   :  { %2724 = vrsqrt.f32 %v2130_v33  ;;  %v2129_v55 = vmul.f32 0.03125, %v2127_v59 }
0x1a0a   :  { %v2131_v60 = vadd.f32 1e-05, %v2129_v55 }
0x1a0c   :  { %2726 = vrsqrt.f32 %v2131_v60 }
0x1a15   :  { %v2725_v57 = vpop.eup %2724 }
0x1a16   :  { %v2134_v58 = vmul.f32 %v2725_v57, %v2118_v28 }
0x1a18   :  { %v2142_v63 = vmul.f32 %v2296_v29, %v2134_v58 }
0x1a19   :  { %v2727_v0 = vpop.eup %2726 }
0x1a1a   :  { %v2135_v1 = vmul.f32 %v2727_v0, %v2119_v46  ;;  %v2150_v4 = vadd.f32 %v2297_v17, %v2142_v63 }
0x1a1c   :  { %v2143_v5 = vmul.f32 %v2296_v29, %v2135_v1  ;;  %2152 = vst.msk [vmem:[#allocation3] sm:$0xff] %vm182_vm4, %v2150_v4 }
0x1a1e   :  { %v2151_v20 = vadd.f32 %v2297_v17, %v2143_v5 }
0x1a20   :  { %2153 = vst.msk [vmem:[#allocation3 + $0x8] sm:$0xff] %vm182_vm4, %v2151_v20 }
0x1a21   :  { %2739 = shalt.err (!%p2736_p4)
}
0x1a22   :  { %s2769_s15 = smov 128  }
0x1a23   :  { %2165 = dma.vmem_to_hbm [thread:$0]  %s2160_s11, 256, %s3457_s17, [#allocation4], %s2769_s15, %s2769_s15, %s3474_s6  }
0x1a24   :  { %2748 = dma.done.wait [#allocation4], 256  }
0x1a25   :  { %2749 = vsyncadd [#allocation4], 4294967040 }
0x1a26   :  { %2169 = vsyncpa [#allocation4], 1 }

</bundles_post_ra>
